<compile_context>
chip_gen: v6e
topology: v6e:2x2x1
jax: 0.10.0
libtpu: 0.0.40
codegen_flags: <defaults>
</compile_context>

<pallas_src>
import numpy as np
import jax
import jax.numpy as jnp
from jax import lax
from jax.experimental import pallas as pl
from jax.experimental.pallas import tpu as pltpu

_TB_MAX = 64  # max images per grid step (sweepable 32-128)


def _round_up(v, m):
    return ((v + m - 1) // m) * m


def _qnet_kernel(x_ref, w1_ref, w2_ref, w3_ref, wt_ref, b_ref, mask_ref,
                 out_ref, h1_ref):
    tb = out_ref.shape[0]
    ho1 = h1_ref.shape[0]          # H - 1
    ho2 = w3_ref.shape[0]          # H - 2
    n1 = w1_ref.shape[1]           # Wo1 * C1
    n2 = w2_ref.shape[2]           # Wo2 * C2
    hd = w3_ref.shape[2]           # 64
    a_pad = out_ref.shape[1]       # padded action lanes (multiple of 128)

    bias = b_ref[...]              # (8, bw) f32, tiny
    b1 = bias[0:1, :n1]
    b2 = bias[1:2, :n2]
    b3 = bias[2:3, :hd]
    b4 = bias[3:4, :a_pad]
    b5 = bias[4:5, :a_pad]

    # ---- conv1 (2x2 valid) + ReLU: one bf16 MXU dot per output-row band ----
    # (both kernel rows merged into w1, input rows pre-concatenated on lanes);
    # result staged in VMEM scratch as bf16.
    w1 = w1_ref[...]
    for h in range(ho1):
        a1 = jnp.dot(x_ref[h], w1, preferred_element_type=jnp.float32)
        h1_ref[h] = jnp.maximum(a1 + b1, 0.0).astype(jnp.bfloat16)

    # ---- conv2 (2x2 valid) + ReLU fused with the fc1 contraction ------------
    # each conv2 band is consumed immediately by its fc1 slice (h2 never hits
    # VMEM); fc1 accumulator stays in registers in f32.
    f1 = jnp.zeros((tb, hd), jnp.float32)
    for h in range(ho2):
        a2 = jnp.dot(h1_ref[h], w2_ref[0], preferred_element_type=jnp.float32)
        a2 = a2 + jnp.dot(h1_ref[h + 1], w2_ref[1],
                          preferred_element_type=jnp.float32)
        h2 = jnp.maximum(a2 + b2, 0.0).astype(jnp.bfloat16)
        f1 = f1 + jnp.dot(h2, w3_ref[h], preferred_element_type=jnp.float32)
    f1 = jnp.maximum(f1 + b3, 0.0).astype(jnp.bfloat16)

    # ---- fc2 + ReLU, fc3 (+bias), action mask (lane-dense, 128-wide) --------
    w4 = wt_ref[pl.ds(0, hd), :]
    f2 = jnp.maximum(jnp.dot(f1, w4, preferred_element_type=jnp.float32) + b4,
                     0.0)
    w5 = wt_ref[pl.ds(hd, a_pad), :]
    logits = jnp.dot(f2.astype(jnp.bfloat16), w5,
                     preferred_element_type=jnp.float32) + b5
    out_ref[...] = jnp.where(mask_ref[...] == 0.0, -jnp.inf, logits)


def _band_conv_weight(w_row, wo):
    """Fold one kernel row of a width-2 conv into a banded (W_in*Cin, Wo*Cout)
    matrix acting on lane layout (w*Cin + cin) -> (wo*Cout + cout)."""
    cout, cin, kw = w_row.shape
    w_in = wo + 1
    mat = jnp.zeros((w_in, cin, wo, cout), jnp.float32)
    for dx in range(kw):
        sel = (jnp.arange(w_in)[:, None] == jnp.arange(wo)[None, :] + dx)
        mat = mat + jnp.einsum('io,cd->icod', sel.astype(jnp.float32),
                               w_row[:, :, dx].T.astype(jnp.float32))
    return mat.reshape(w_in * cin, wo * cout)


def qnet_forward(x_nchw, params, mask, tb=None):
    """x_nchw: (B, 2, H, W) f32; mask: (B, A) (0 = invalid action)."""
    w1, b1, w2, b2, w3, b3, w4, b4, w5, b5 = params
    B, Cin, H, W = x_nchw.shape
    C1, C2 = w1.shape[0], w2.shape[0]
    Ho1, Wo1 = H - 1, W - 1
    Ho2, Wo2 = H - 2, W - 2
    Hd = w3.shape[0]                                  # 64
    H3 = w4.shape[0]                                  # 32
    A = w5.shape[0]
    A_pad = _round_up(A, 128)                         # lane-dense output

    if tb is None:
        # Big batch tile amortizes per-grid-step overhead and raises matmul M;
        # keep nb >= 2 when the batch allows so v7x can shard over both TCs.
        tb = min(_TB_MAX, max(8, _round_up(B, 16) // 2))
    tb = _round_up(tb, 8)
    B_pad = _round_up(B, tb)
    nb = B_pad // tb

    # ---- plain-JAX layout plumbing ------------------------------------------
    # kernel activation layout: rows = images of one h-band, lanes = (w, chan);
    # the two conv1 kernel rows are pre-concatenated on lanes (im2row over h).
    x = jnp.transpose(x_nchw, (0, 2, 3, 1)).astype(jnp.float32).reshape(B, H, W * Cin)
    xcat = jnp.concatenate([x[:, :-1, :], x[:, 1:, :]], axis=-1)      # (B, Ho1, 2*W*Cin)
    xcat = jnp.pad(xcat, ((0, B_pad - B), (0, 0), (0, 0)))
    xcat = xcat.reshape(nb, tb, Ho1, 2 * W * Cin).transpose(0, 2, 1, 3)
    xcat = xcat.astype(jnp.bfloat16)                                  # (nb, Ho1, tb, 2*W*Cin)

    w1ab = jnp.concatenate([_band_conv_weight(w1[:, :, 0, :], Wo1),
                            _band_conv_weight(w1[:, :, 1, :], Wo1)],
                           axis=0).astype(jnp.bfloat16)               # (2*W*Cin, Wo1*C1)
    w2s = jnp.stack([_band_conv_weight(w2[:, :, 0, :], Wo2),
                     _band_conv_weight(w2[:, :, 1, :], Wo2)],
                    axis=0).astype(jnp.bfloat16)                      # (2, Wo1*C1, Wo2*C2)

    # PyTorch flatten order is (c, h, w); fold it into the fc1 weight, split by h.
    w3k = jnp.transpose(w3.reshape(Hd, C2, Ho2, Wo2), (2, 3, 1, 0))
    w3k = w3k.reshape(Ho2, Wo2 * C2, Hd).astype(jnp.bfloat16)         # (Ho2, Wo2*C2, Hd)

    # fc2/fc3 packed into one lane-dense slab. Padded fc2 lanes are 0 after
    # ReLU (bias padded with 0) and the matching fc3 rows are 0, so the
    # padding is inert.
    w4p = jnp.zeros((Hd, A_pad), jnp.float32).at[:, :H3].set(w4.T.astype(jnp.float32))
    w5p = jnp.zeros((A_pad, A_pad), jnp.float32).at[:H3, :A].set(w5.T.astype(jnp.float32))
    wt = jnp.concatenate([w4p, w5p], axis=0).astype(jnp.bfloat16)     # (Hd + A_pad, A_pad)

    # all biases in one small f32 table (bias + ReLU stay in f32 on the VPU)
    bw = _round_up(max(Wo1 * C1, Wo2 * C2, Hd, A_pad), 128)
    ball = jnp.zeros((8, bw), jnp.float32)
    ball = ball.at[0, :Wo1 * C1].set(jnp.tile(b1.astype(jnp.float32), Wo1))
    ball = ball.at[1, :Wo2 * C2].set(jnp.tile(b2.astype(jnp.float32), Wo2))
    ball = ball.at[2, :Hd].set(b3.astype(jnp.float32))
    ball = ball.at[3, :H3].set(b4.astype(jnp.float32))
    ball = ball.at[4, :A].set(b5.astype(jnp.float32))

    maskp = jnp.pad(mask.astype(jnp.float32), ((0, B_pad - B), (0, A_pad - A)),
                    constant_values=1.0)

    def _full(arr):
        zeros = (0,) * arr.ndim
        return pl.BlockSpec(arr.shape, lambda b, _z=zeros: _z)

    grid_spec = pltpu.PrefetchScalarGridSpec(
        num_scalar_prefetch=0,
        grid=(nb,),
        in_specs=[
            pl.BlockSpec((None, Ho1, tb, 2 * W * Cin), lambda b: (b, 0, 0, 0)),
            _full(w1ab), _full(w2s), _full(w3k), _full(wt), _full(ball),
            pl.BlockSpec((tb, A_pad), lambda b: (b, 0)),
        ],
        out_specs=pl.BlockSpec((tb, A_pad), lambda b: (b, 0)),
        scratch_shapes=[pltpu.VMEM((Ho1, tb, Wo1 * C1), jnp.bfloat16)],
    )

    out = pl.pallas_call(
        _qnet_kernel,
        out_shape=jax.ShapeDtypeStruct((B_pad, A_pad), jnp.float32),
        grid_spec=grid_spec,
        compiler_params=pltpu.CompilerParams(dimension_semantics=("parallel",)),
    )(xcat, w1ab, w2s, w3k, wt, ball, maskp)
    return out[:B, :A]


def init_params(key, grid_size, num_actions):
    """Deterministic synthetic init with PyTorch-convention shapes."""
    n, m = grid_size
    ks = jax.random.split(key, 10)

    def rnd(k, shape, fan_in):
        return (jax.random.normal(k, shape, jnp.float32) / np.sqrt(fan_in)).astype(jnp.float32)

    fin = 32 * (n - 2) * (m - 2)
    w1 = rnd(ks[0], (32, 2, 2, 2), 2 * 4)       # Conv2d(2, 32, k=2)
    b1 = rnd(ks[1], (32,), 8)
    w2 = rnd(ks[2], (32, 32, 2, 2), 32 * 4)     # Conv2d(32, 32, k=2)
    b2 = rnd(ks[3], (32,), 128)
    w3 = rnd(ks[4], (64, fin), fin)             # Linear(fin, 64)
    b3 = rnd(ks[5], (64,), fin)
    w4 = rnd(ks[6], (32, 64), 64)               # Linear(64, 32)
    b4 = rnd(ks[7], (32,), 64)
    w5 = rnd(ks[8], (num_actions, 32), 32)      # Linear(32, num_actions)
    b5 = rnd(ks[9], (num_actions,), 32)
    return (w1, b1, w2, b2, w3, b3, w4, b4, w5, b5)


def ref_forward(x_nchw, params, mask):
    """Pure-JAX f32 reference matching the PyTorch forward (NCHW semantics)."""
    w1, b1, w2, b2, w3, b3, w4, b4, w5, b5 = params
    dn = ('NCHW', 'OIHW', 'NCHW')
    y = lax.conv_general_dilated(x_nchw, w1, (1, 1), 'VALID', dimension_numbers=dn)
    y = jnp.maximum(y + b1[None, :, None, None], 0.0)
    y = lax.conv_general_dilated(y, w2, (1, 1), 'VALID', dimension_numbers=dn)
    y = jnp.maximum(y + b2[None, :, None, None], 0.0)
    y = y.reshape(y.shape[0], -1)
    y = jnp.maximum(y @ w3.T + b3, 0.0)
    y = jnp.maximum(y @ w4.T + b4, 0.0)
    y = y @ w5.T + b5
    return jnp.where(mask == 0, -jnp.inf, y)


if __name__ == "__main__":
    grid_size = (8, 8)
    num_actions = 4
    B = 2

    key = jax.random.PRNGKey(0)
    kx, kp, km = jax.random.split(key, 3)
    params = init_params(kp, grid_size, num_actions)
    x = jax.random.normal(kx, (B, 2, grid_size[0], grid_size[1]), jnp.float32)
    mask = (jax.random.uniform(km, (B, num_actions)) > 0.3).astype(jnp.float32)
    mask = mask.at[:, 0].set(1.0)   # keep at least one valid action per row

    out = qnet_forward(x, params, mask)
    out = jax.block_until_ready(out)

    ref = ref_forward(x, params, mask)
    # bf16 MXU operands vs f32 reference: slightly looser tolerance.
    np.testing.assert_allclose(np.asarray(out), np.asarray(ref), rtol=5e-2, atol=5e-2)

    # second check: multi-block grid + batch padding path (tb heuristic, nb > 1)
    B2 = 40
    kx2, km2 = jax.random.split(kx)
    x2 = jax.random.normal(kx2, (B2, 2, grid_size[0], grid_size[1]), jnp.float32)
    mask2 = (jax.random.uniform(km2, (B2, num_actions)) > 0.3).astype(jnp.float32)
    mask2 = mask2.at[:, 0].set(1.0)
    out2 = jax.block_until_ready(qnet_forward(x2, params, mask2))
    ref2 = ref_forward(x2, params, mask2)
    np.testing.assert_allclose(np.asarray(out2), np.asarray(ref2), rtol=5e-2, atol=5e-2)

    print("KERNEL_OK")
</pallas_src>

<mosaic_0001>
module attributes {stable_mosaic.version = 11 : i64} {
  func.func @_qnet_kernel(%arg0: i32, %arg1: memref<1x7x8x32xbf16, #tpu.memory_space<vmem>>, %arg2: memref<32x224xbf16, #tpu.memory_space<vmem>>, %arg3: memref<2x224x192xbf16, #tpu.memory_space<vmem>>, %arg4: memref<6x192x64xbf16, #tpu.memory_space<vmem>>, %arg5: memref<192x128xbf16, #tpu.memory_space<vmem>>, %arg6: memref<8x256xf32, #tpu.memory_space<vmem>>, %arg7: memref<8x128xf32, #tpu.memory_space<vmem>>, %arg8: memref<8x128xf32, #tpu.memory_space<vmem>>, %arg9: memref<7x8x224xbf16, #tpu.memory_space<vmem>>) attributes {dimension_semantics = [#tpu.dimension_semantics<parallel>], iteration_bounds = array<i64: 1>, scalar_prefetch = 0 : i64, scratch_operands = 1 : i64, tpu.core_type = #tpu.core_type<tc>, window_params = [{transform_indices = @transform_0, window_bounds = array<i64: 1, 7, 8, 32>}, {pipeline_mode = #tpu.pipeline_mode<synchronous>, transform_indices = @transform_1, window_bounds = array<i64: 32, 224>}, {pipeline_mode = #tpu.pipeline_mode<synchronous>, transform_indices = @transform_2, window_bounds = array<i64: 2, 224, 192>}, {pipeline_mode = #tpu.pipeline_mode<synchronous>, transform_indices = @transform_3, window_bounds = array<i64: 6, 192, 64>}, {pipeline_mode = #tpu.pipeline_mode<synchronous>, transform_indices = @transform_4, window_bounds = array<i64: 192, 128>}, {pipeline_mode = #tpu.pipeline_mode<synchronous>, transform_indices = @transform_5, window_bounds = array<i64: 8, 256>}, {transform_indices = @transform_6, window_bounds = array<i64: 8, 128>}, {transform_indices = @transform_7, window_bounds = array<i64: 8, 128>}]} {
    %c0 = arith.constant 0 : index
    %c0_0 = arith.constant 0 : index
    %0 = vector.load %arg6[%c0, %c0_0] : memref<8x256xf32, #tpu.memory_space<vmem>>, vector<8x256xf32>
    %1 = vector.extract_strided_slice %0 {offsets = [0, 0], sizes = [1, 224], strides = [1, 1]} : vector<8x256xf32> to vector<1x224xf32>
    %2 = vector.extract_strided_slice %0 {offsets = [1, 0], sizes = [1, 192], strides = [1, 1]} : vector<8x256xf32> to vector<1x192xf32>
    %3 = vector.extract_strided_slice %0 {offsets = [2, 0], sizes = [1, 64], strides = [1, 1]} : vector<8x256xf32> to vector<1x64xf32>
    %4 = vector.extract_strided_slice %0 {offsets = [3, 0], sizes = [1, 128], strides = [1, 1]} : vector<8x256xf32> to vector<1x128xf32>
    %5 = vector.extract_strided_slice %0 {offsets = [4, 0], sizes = [1, 128], strides = [1, 1]} : vector<8x256xf32> to vector<1x128xf32>
    %c0_1 = arith.constant 0 : index
    %c0_2 = arith.constant 0 : index
    %6 = vector.load %arg2[%c0_1, %c0_2] : memref<32x224xbf16, #tpu.memory_space<vmem>>, vector<32x224xbf16>
    %c0_3 = arith.constant 0 : index
    %c0_4 = arith.constant 0 : index
    %c0_5 = arith.constant 0 : index
    %c0_6 = arith.constant 0 : index
    %7 = vector.load %arg1[%c0_3, %c0_4, %c0_5, %c0_6] : memref<1x7x8x32xbf16, #tpu.memory_space<vmem>>, vector<1x1x8x32xbf16>
    %8 = vector.shape_cast %7 : vector<1x1x8x32xbf16> to vector<8x32xbf16>
    %cst = arith.constant dense<0.000000e+00> : vector<8x224xf32>
    %9 = tpu.matmul %8, %6, %cst {dimension_numbers = #tpu.dot_dimension_numbers<[1], [0], [0], [1], [0, 0, 1, 1], [], []>} : vector<8x32xbf16>, vector<32x224xbf16>, vector<8x224xf32> -> vector<8x224xf32>
    %10 = vector.broadcast %1 : vector<1x224xf32> to vector<8x224xf32>
    %11 = arith.addf %9, %10 : vector<8x224xf32>
    %cst_7 = arith.constant 0.000000e+00 : f32
    %12 = vector.broadcast %cst_7 : f32 to vector<8x224xf32>
    %13 = arith.maximumf %11, %12 : vector<8x224xf32>
    %14 = arith.truncf %13 : vector<8x224xf32> to vector<8x224xbf16>
    %c0_8 = arith.constant 0 : index
    %c0_9 = arith.constant 0 : index
    %c0_10 = arith.constant 0 : index
    %15 = vector.load %arg9[%c0_8, %c0_9, %c0_10] : memref<7x8x224xbf16, #tpu.memory_space<vmem>>, vector<1x8x224xbf16>
    %16 = vector.shape_cast %15 : vector<1x8x224xbf16> to vector<8x224xbf16>
    %17 = vector.shape_cast %14 : vector<8x224xbf16> to vector<1x8x224xbf16>
    tpu.vector_store %arg9[%c0_8, %c0_9, %c0_10], %17 {strides = array<i32>} : memref<7x8x224xbf16, #tpu.memory_space<vmem>>, vector<1x8x224xbf16>,
    %c0_11 = arith.constant 0 : index
    %c1 = arith.constant 1 : index
    %c0_12 = arith.constant 0 : index
    %c0_13 = arith.constant 0 : index
    %18 = vector.load %arg1[%c0_11, %c1, %c0_12, %c0_13] : memref<1x7x8x32xbf16, #tpu.memory_space<vmem>>, vector<1x1x8x32xbf16>
    %19 = vector.shape_cast %18 : vector<1x1x8x32xbf16> to vector<8x32xbf16>
    %cst_14 = arith.constant dense<0.000000e+00> : vector<8x224xf32>
    %20 = tpu.matmul %19, %6, %cst_14 {dimension_numbers = #tpu.dot_dimension_numbers<[1], [0], [0], [1], [0, 0, 1, 1], [], []>} : vector<8x32xbf16>, vector<32x224xbf16>, vector<8x224xf32> -> vector<8x224xf32>
    %21 = vector.broadcast %1 : vector<1x224xf32> to vector<8x224xf32>
    %22 = arith.addf %20, %21 : vector<8x224xf32>
    %cst_15 = arith.constant 0.000000e+00 : f32
    %23 = vector.broadcast %cst_15 : f32 to vector<8x224xf32>
    %24 = arith.maximumf %22, %23 : vector<8x224xf32>
    %25 = arith.truncf %24 : vector<8x224xf32> to vector<8x224xbf16>
    %c1_16 = arith.constant 1 : index
    %c0_17 = arith.constant 0 : index
    %c0_18 = arith.constant 0 : index
    %26 = vector.load %arg9[%c1_16, %c0_17, %c0_18] : memref<7x8x224xbf16, #tpu.memory_space<vmem>>, vector<1x8x224xbf16>
    %27 = vector.shape_cast %26 : vector<1x8x224xbf16> to vector<8x224xbf16>
    %28 = vector.shape_cast %25 : vector<8x224xbf16> to vector<1x8x224xbf16>
    tpu.vector_store %arg9[%c1_16, %c0_17, %c0_18], %28 {strides = array<i32>} : memref<7x8x224xbf16, #tpu.memory_space<vmem>>, vector<1x8x224xbf16>,
    %c0_19 = arith.constant 0 : index
    %c2 = arith.constant 2 : index
    %c0_20 = arith.constant 0 : index
    %c0_21 = arith.constant 0 : index
    %29 = vector.load %arg1[%c0_19, %c2, %c0_20, %c0_21] : memref<1x7x8x32xbf16, #tpu.memory_space<vmem>>, vector<1x1x8x32xbf16>
    %30 = vector.shape_cast %29 : vector<1x1x8x32xbf16> to vector<8x32xbf16>
    %cst_22 = arith.constant dense<0.000000e+00> : vector<8x224xf32>
    %31 = tpu.matmul %30, %6, %cst_22 {dimension_numbers = #tpu.dot_dimension_numbers<[1], [0], [0], [1], [0, 0, 1, 1], [], []>} : vector<8x32xbf16>, vector<32x224xbf16>, vector<8x224xf32> -> vector<8x224xf32>
    %32 = vector.broadcast %1 : vector<1x224xf32> to vector<8x224xf32>
    %33 = arith.addf %31, %32 : vector<8x224xf32>
    %cst_23 = arith.constant 0.000000e+00 : f32
    %34 = vector.broadcast %cst_23 : f32 to vector<8x224xf32>
    %35 = arith.maximumf %33, %34 : vector<8x224xf32>
    %36 = arith.truncf %35 : vector<8x224xf32> to vector<8x224xbf16>
    %c2_24 = arith.constant 2 : index
    %c0_25 = arith.constant 0 : index
    %c0_26 = arith.constant 0 : index
    %37 = vector.load %arg9[%c2_24, %c0_25, %c0_26] : memref<7x8x224xbf16, #tpu.memory_space<vmem>>, vector<1x8x224xbf16>
    %38 = vector.shape_cast %37 : vector<1x8x224xbf16> to vector<8x224xbf16>
    %39 = vector.shape_cast %36 : vector<8x224xbf16> to vector<1x8x224xbf16>
    tpu.vector_store %arg9[%c2_24, %c0_25, %c0_26], %39 {strides = array<i32>} : memref<7x8x224xbf16, #tpu.memory_space<vmem>>, vector<1x8x224xbf16>,
    %c0_27 = arith.constant 0 : index
    %c3 = arith.constant 3 : index
    %c0_28 = arith.constant 0 : index
    %c0_29 = arith.constant 0 : index
    %40 = vector.load %arg1[%c0_27, %c3, %c0_28, %c0_29] : memref<1x7x8x32xbf16, #tpu.memory_space<vmem>>, vector<1x1x8x32xbf16>
    %41 = vector.shape_cast %40 : vector<1x1x8x32xbf16> to vector<8x32xbf16>
    %cst_30 = arith.constant dense<0.000000e+00> : vector<8x224xf32>
    %42 = tpu.matmul %41, %6, %cst_30 {dimension_numbers = #tpu.dot_dimension_numbers<[1], [0], [0], [1], [0, 0, 1, 1], [], []>} : vector<8x32xbf16>, vector<32x224xbf16>, vector<8x224xf32> -> vector<8x224xf32>
    %43 = vector.broadcast %1 : vector<1x224xf32> to vector<8x224xf32>
    %44 = arith.addf %42, %43 : vector<8x224xf32>
    %cst_31 = arith.constant 0.000000e+00 : f32
    %45 = vector.broadcast %cst_31 : f32 to vector<8x224xf32>
    %46 = arith.maximumf %44, %45 : vector<8x224xf32>
    %47 = arith.truncf %46 : vector<8x224xf32> to vector<8x224xbf16>
    %c3_32 = arith.constant 3 : index
    %c0_33 = arith.constant 0 : index
    %c0_34 = arith.constant 0 : index
    %48 = vector.load %arg9[%c3_32, %c0_33, %c0_34] : memref<7x8x224xbf16, #tpu.memory_space<vmem>>, vector<1x8x224xbf16>
    %49 = vector.shape_cast %48 : vector<1x8x224xbf16> to vector<8x224xbf16>
    %50 = vector.shape_cast %47 : vector<8x224xbf16> to vector<1x8x224xbf16>
    tpu.vector_store %arg9[%c3_32, %c0_33, %c0_34], %50 {strides = array<i32>} : memref<7x8x224xbf16, #tpu.memory_space<vmem>>, vector<1x8x224xbf16>,
    %c0_35 = arith.constant 0 : index
    %c4 = arith.constant 4 : index
    %c0_36 = arith.constant 0 : index
    %c0_37 = arith.constant 0 : index
    %51 = vector.load %arg1[%c0_35, %c4, %c0_36, %c0_37] : memref<1x7x8x32xbf16, #tpu.memory_space<vmem>>, vector<1x1x8x32xbf16>
    %52 = vector.shape_cast %51 : vector<1x1x8x32xbf16> to vector<8x32xbf16>
    %cst_38 = arith.constant dense<0.000000e+00> : vector<8x224xf32>
    %53 = tpu.matmul %52, %6, %cst_38 {dimension_numbers = #tpu.dot_dimension_numbers<[1], [0], [0], [1], [0, 0, 1, 1], [], []>} : vector<8x32xbf16>, vector<32x224xbf16>, vector<8x224xf32> -> vector<8x224xf32>
    %54 = vector.broadcast %1 : vector<1x224xf32> to vector<8x224xf32>
    %55 = arith.addf %53, %54 : vector<8x224xf32>
    %cst_39 = arith.constant 0.000000e+00 : f32
    %56 = vector.broadcast %cst_39 : f32 to vector<8x224xf32>
    %57 = arith.maximumf %55, %56 : vector<8x224xf32>
    %58 = arith.truncf %57 : vector<8x224xf32> to vector<8x224xbf16>
    %c4_40 = arith.constant 4 : index
    %c0_41 = arith.constant 0 : index
    %c0_42 = arith.constant 0 : index
    %59 = vector.load %arg9[%c4_40, %c0_41, %c0_42] : memref<7x8x224xbf16, #tpu.memory_space<vmem>>, vector<1x8x224xbf16>
    %60 = vector.shape_cast %59 : vector<1x8x224xbf16> to vector<8x224xbf16>
    %61 = vector.shape_cast %58 : vector<8x224xbf16> to vector<1x8x224xbf16>
    tpu.vector_store %arg9[%c4_40, %c0_41, %c0_42], %61 {strides = array<i32>} : memref<7x8x224xbf16, #tpu.memory_space<vmem>>, vector<1x8x224xbf16>,
    %c0_43 = arith.constant 0 : index
    %c5 = arith.constant 5 : index
    %c0_44 = arith.constant 0 : index
    %c0_45 = arith.constant 0 : index
    %62 = vector.load %arg1[%c0_43, %c5, %c0_44, %c0_45] : memref<1x7x8x32xbf16, #tpu.memory_space<vmem>>, vector<1x1x8x32xbf16>
    %63 = vector.shape_cast %62 : vector<1x1x8x32xbf16> to vector<8x32xbf16>
    %cst_46 = arith.constant dense<0.000000e+00> : vector<8x224xf32>
    %64 = tpu.matmul %63, %6, %cst_46 {dimension_numbers = #tpu.dot_dimension_numbers<[1], [0], [0], [1], [0, 0, 1, 1], [], []>} : vector<8x32xbf16>, vector<32x224xbf16>, vector<8x224xf32> -> vector<8x224xf32>
    %65 = vector.broadcast %1 : vector<1x224xf32> to vector<8x224xf32>
    %66 = arith.addf %64, %65 : vector<8x224xf32>
    %cst_47 = arith.constant 0.000000e+00 : f32
    %67 = vector.broadcast %cst_47 : f32 to vector<8x224xf32>
    %68 = arith.maximumf %66, %67 : vector<8x224xf32>
    %69 = arith.truncf %68 : vector<8x224xf32> to vector<8x224xbf16>
    %c5_48 = arith.constant 5 : index
    %c0_49 = arith.constant 0 : index
    %c0_50 = arith.constant 0 : index
    %70 = vector.load %arg9[%c5_48, %c0_49, %c0_50] : memref<7x8x224xbf16, #tpu.memory_space<vmem>>, vector<1x8x224xbf16>
    %71 = vector.shape_cast %70 : vector<1x8x224xbf16> to vector<8x224xbf16>
    %72 = vector.shape_cast %69 : vector<8x224xbf16> to vector<1x8x224xbf16>
    tpu.vector_store %arg9[%c5_48, %c0_49, %c0_50], %72 {strides = array<i32>} : memref<7x8x224xbf16, #tpu.memory_space<vmem>>, vector<1x8x224xbf16>,
    %c0_51 = arith.constant 0 : index
    %c6 = arith.constant 6 : index
    %c0_52 = arith.constant 0 : index
    %c0_53 = arith.constant 0 : index
    %73 = vector.load %arg1[%c0_51, %c6, %c0_52, %c0_53] : memref<1x7x8x32xbf16, #tpu.memory_space<vmem>>, vector<1x1x8x32xbf16>
    %74 = vector.shape_cast %73 : vector<1x1x8x32xbf16> to vector<8x32xbf16>
    %cst_54 = arith.constant dense<0.000000e+00> : vector<8x224xf32>
    %75 = tpu.matmul %74, %6, %cst_54 {dimension_numbers = #tpu.dot_dimension_numbers<[1], [0], [0], [1], [0, 0, 1, 1], [], []>} : vector<8x32xbf16>, vector<32x224xbf16>, vector<8x224xf32> -> vector<8x224xf32>
    %76 = vector.broadcast %1 : vector<1x224xf32> to vector<8x224xf32>
    %77 = arith.addf %75, %76 : vector<8x224xf32>
    %cst_55 = arith.constant 0.000000e+00 : f32
    %78 = vector.broadcast %cst_55 : f32 to vector<8x224xf32>
    %79 = arith.maximumf %77, %78 : vector<8x224xf32>
    %80 = arith.truncf %79 : vector<8x224xf32> to vector<8x224xbf16>
    %c6_56 = arith.constant 6 : index
    %c0_57 = arith.constant 0 : index
    %c0_58 = arith.constant 0 : index
    %81 = vector.load %arg9[%c6_56, %c0_57, %c0_58] : memref<7x8x224xbf16, #tpu.memory_space<vmem>>, vector<1x8x224xbf16>
    %82 = vector.shape_cast %81 : vector<1x8x224xbf16> to vector<8x224xbf16>
    %83 = vector.shape_cast %80 : vector<8x224xbf16> to vector<1x8x224xbf16>
    tpu.vector_store %arg9[%c6_56, %c0_57, %c0_58], %83 {strides = array<i32>} : memref<7x8x224xbf16, #tpu.memory_space<vmem>>, vector<1x8x224xbf16>,
    %cst_59 = arith.constant 0.000000e+00 : f32
    %84 = vector.broadcast %cst_59 : f32 to vector<8x64xf32>
    %c0_60 = arith.constant 0 : index
    %c0_61 = arith.constant 0 : index
    %c0_62 = arith.constant 0 : index
    %85 = vector.load %arg9[%c0_60, %c0_61, %c0_62] : memref<7x8x224xbf16, #tpu.memory_space<vmem>>, vector<1x8x224xbf16>
    %86 = vector.shape_cast %85 : vector<1x8x224xbf16> to vector<8x224xbf16>
    %c0_63 = arith.constant 0 : index
    %c0_64 = arith.constant 0 : index
    %c0_65 = arith.constant 0 : index
    %87 = vector.load %arg3[%c0_63, %c0_64, %c0_65] : memref<2x224x192xbf16, #tpu.memory_space<vmem>>, vector<1x224x192xbf16>
    %88 = vector.shape_cast %87 : vector<1x224x192xbf16> to vector<224x192xbf16>
    %cst_66 = arith.constant dense<0.000000e+00> : vector<8x192xf32>
    %89 = tpu.matmul %86, %88, %cst_66 {dimension_numbers = #tpu.dot_dimension_numbers<[1], [0], [0], [1], [0, 0, 1, 1], [], []>} : vector<8x224xbf16>, vector<224x192xbf16>, vector<8x192xf32> -> vector<8x192xf32>
    %c1_67 = arith.constant 1 : index
    %c0_68 = arith.constant 0 : index
    %c0_69 = arith.constant 0 : index
    %90 = vector.load %arg9[%c1_67, %c0_68, %c0_69] : memref<7x8x224xbf16, #tpu.memory_space<vmem>>, vector<1x8x224xbf16>
    %91 = vector.shape_cast %90 : vector<1x8x224xbf16> to vector<8x224xbf16>
    %c1_70 = arith.constant 1 : index
    %c0_71 = arith.constant 0 : index
    %c0_72 = arith.constant 0 : index
    %92 = vector.load %arg3[%c1_70, %c0_71, %c0_72] : memref<2x224x192xbf16, #tpu.memory_space<vmem>>, vector<1x224x192xbf16>
    %93 = vector.shape_cast %92 : vector<1x224x192xbf16> to vector<224x192xbf16>
    %cst_73 = arith.constant dense<0.000000e+00> : vector<8x192xf32>
    %94 = tpu.matmul %91, %93, %cst_73 {dimension_numbers = #tpu.dot_dimension_numbers<[1], [0], [0], [1], [0, 0, 1, 1], [], []>} : vector<8x224xbf16>, vector<224x192xbf16>, vector<8x192xf32> -> vector<8x192xf32>
    %95 = arith.addf %89, %94 : vector<8x192xf32>
    %96 = vector.broadcast %2 : vector<1x192xf32> to vector<8x192xf32>
    %97 = arith.addf %95, %96 : vector<8x192xf32>
    %cst_74 = arith.constant 0.000000e+00 : f32
    %98 = vector.broadcast %cst_74 : f32 to vector<8x192xf32>
    %99 = arith.maximumf %97, %98 : vector<8x192xf32>
    %100 = arith.truncf %99 : vector<8x192xf32> to vector<8x192xbf16>
    %c0_75 = arith.constant 0 : index
    %c0_76 = arith.constant 0 : index
    %c0_77 = arith.constant 0 : index
    %101 = vector.load %arg4[%c0_75, %c0_76, %c0_77] : memref<6x192x64xbf16, #tpu.memory_space<vmem>>, vector<1x192x64xbf16>
    %102 = vector.shape_cast %101 : vector<1x192x64xbf16> to vector<192x64xbf16>
    %cst_78 = arith.constant dense<0.000000e+00> : vector<8x64xf32>
    %103 = tpu.matmul %100, %102, %cst_78 {dimension_numbers = #tpu.dot_dimension_numbers<[1], [0], [0], [1], [0, 0, 1, 1], [], []>} : vector<8x192xbf16>, vector<192x64xbf16>, vector<8x64xf32> -> vector<8x64xf32>
    %104 = arith.addf %84, %103 : vector<8x64xf32>
    %c1_79 = arith.constant 1 : index
    %c0_80 = arith.constant 0 : index
    %c0_81 = arith.constant 0 : index
    %105 = vector.load %arg9[%c1_79, %c0_80, %c0_81] : memref<7x8x224xbf16, #tpu.memory_space<vmem>>, vector<1x8x224xbf16>
    %106 = vector.shape_cast %105 : vector<1x8x224xbf16> to vector<8x224xbf16>
    %c0_82 = arith.constant 0 : index
    %c0_83 = arith.constant 0 : index
    %c0_84 = arith.constant 0 : index
    %107 = vector.load %arg3[%c0_82, %c0_83, %c0_84] : memref<2x224x192xbf16, #tpu.memory_space<vmem>>, vector<1x224x192xbf16>
    %108 = vector.shape_cast %107 : vector<1x224x192xbf16> to vector<224x192xbf16>
    %cst_85 = arith.constant dense<0.000000e+00> : vector<8x192xf32>
    %109 = tpu.matmul %106, %108, %cst_85 {dimension_numbers = #tpu.dot_dimension_numbers<[1], [0], [0], [1], [0, 0, 1, 1], [], []>} : vector<8x224xbf16>, vector<224x192xbf16>, vector<8x192xf32> -> vector<8x192xf32>
    %c2_86 = arith.constant 2 : index
    %c0_87 = arith.constant 0 : index
    %c0_88 = arith.constant 0 : index
    %110 = vector.load %arg9[%c2_86, %c0_87, %c0_88] : memref<7x8x224xbf16, #tpu.memory_space<vmem>>, vector<1x8x224xbf16>
    %111 = vector.shape_cast %110 : vector<1x8x224xbf16> to vector<8x224xbf16>
    %c1_89 = arith.constant 1 : index
    %c0_90 = arith.constant 0 : index
    %c0_91 = arith.constant 0 : index
    %112 = vector.load %arg3[%c1_89, %c0_90, %c0_91] : memref<2x224x192xbf16, #tpu.memory_space<vmem>>, vector<1x224x192xbf16>
    %113 = vector.shape_cast %112 : vector<1x224x192xbf16> to vector<224x192xbf16>
    %cst_92 = arith.constant dense<0.000000e+00> : vector<8x192xf32>
    %114 = tpu.matmul %111, %113, %cst_92 {dimension_numbers = #tpu.dot_dimension_numbers<[1], [0], [0], [1], [0, 0, 1, 1], [], []>} : vector<8x224xbf16>, vector<224x192xbf16>, vector<8x192xf32> -> vector<8x192xf32>
    %115 = arith.addf %109, %114 : vector<8x192xf32>
    %116 = vector.broadcast %2 : vector<1x192xf32> to vector<8x192xf32>
    %117 = arith.addf %115, %116 : vector<8x192xf32>
    %cst_93 = arith.constant 0.000000e+00 : f32
    %118 = vector.broadcast %cst_93 : f32 to vector<8x192xf32>
    %119 = arith.maximumf %117, %118 : vector<8x192xf32>
    %120 = arith.truncf %119 : vector<8x192xf32> to vector<8x192xbf16>
    %c1_94 = arith.constant 1 : index
    %c0_95 = arith.constant 0 : index
    %c0_96 = arith.constant 0 : index
    %121 = vector.load %arg4[%c1_94, %c0_95, %c0_96] : memref<6x192x64xbf16, #tpu.memory_space<vmem>>, vector<1x192x64xbf16>
    %122 = vector.shape_cast %121 : vector<1x192x64xbf16> to vector<192x64xbf16>
    %cst_97 = arith.constant dense<0.000000e+00> : vector<8x64xf32>
    %123 = tpu.matmul %120, %122, %cst_97 {dimension_numbers = #tpu.dot_dimension_numbers<[1], [0], [0], [1], [0, 0, 1, 1], [], []>} : vector<8x192xbf16>, vector<192x64xbf16>, vector<8x64xf32> -> vector<8x64xf32>
    %124 = arith.addf %104, %123 : vector<8x64xf32>
    %c2_98 = arith.constant 2 : index
    %c0_99 = arith.constant 0 : index
    %c0_100 = arith.constant 0 : index
    %125 = vector.load %arg9[%c2_98, %c0_99, %c0_100] : memref<7x8x224xbf16, #tpu.memory_space<vmem>>, vector<1x8x224xbf16>
    %126 = vector.shape_cast %125 : vector<1x8x224xbf16> to vector<8x224xbf16>
    %c0_101 = arith.constant 0 : index
    %c0_102 = arith.constant 0 : index
    %c0_103 = arith.constant 0 : index
    %127 = vector.load %arg3[%c0_101, %c0_102, %c0_103] : memref<2x224x192xbf16, #tpu.memory_space<vmem>>, vector<1x224x192xbf16>
    %128 = vector.shape_cast %127 : vector<1x224x192xbf16> to vector<224x192xbf16>
    %cst_104 = arith.constant dense<0.000000e+00> : vector<8x192xf32>
    %129 = tpu.matmul %126, %128, %cst_104 {dimension_numbers = #tpu.dot_dimension_numbers<[1], [0], [0], [1], [0, 0, 1, 1], [], []>} : vector<8x224xbf16>, vector<224x192xbf16>, vector<8x192xf32> -> vector<8x192xf32>
    %c3_105 = arith.constant 3 : index
    %c0_106 = arith.constant 0 : index
    %c0_107 = arith.constant 0 : index
    %130 = vector.load %arg9[%c3_105, %c0_106, %c0_107] : memref<7x8x224xbf16, #tpu.memory_space<vmem>>, vector<1x8x224xbf16>
    %131 = vector.shape_cast %130 : vector<1x8x224xbf16> to vector<8x224xbf16>
    %c1_108 = arith.constant 1 : index
    %c0_109 = arith.constant 0 : index
    %c0_110 = arith.constant 0 : index
    %132 = vector.load %arg3[%c1_108, %c0_109, %c0_110] : memref<2x224x192xbf16, #tpu.memory_space<vmem>>, vector<1x224x192xbf16>
    %133 = vector.shape_cast %132 : vector<1x224x192xbf16> to vector<224x192xbf16>
    %cst_111 = arith.constant dense<0.000000e+00> : vector<8x192xf32>
    %134 = tpu.matmul %131, %133, %cst_111 {dimension_numbers = #tpu.dot_dimension_numbers<[1], [0], [0], [1], [0, 0, 1, 1], [], []>} : vector<8x224xbf16>, vector<224x192xbf16>, vector<8x192xf32> -> vector<8x192xf32>
    %135 = arith.addf %129, %134 : vector<8x192xf32>
    %136 = vector.broadcast %2 : vector<1x192xf32> to vector<8x192xf32>
    %137 = arith.addf %135, %136 : vector<8x192xf32>
    %cst_112 = arith.constant 0.000000e+00 : f32
    %138 = vector.broadcast %cst_112 : f32 to vector<8x192xf32>
    %139 = arith.maximumf %137, %138 : vector<8x192xf32>
    %140 = arith.truncf %139 : vector<8x192xf32> to vector<8x192xbf16>
    %c2_113 = arith.constant 2 : index
    %c0_114 = arith.constant 0 : index
    %c0_115 = arith.constant 0 : index
    %141 = vector.load %arg4[%c2_113, %c0_114, %c0_115] : memref<6x192x64xbf16, #tpu.memory_space<vmem>>, vector<1x192x64xbf16>
    %142 = vector.shape_cast %141 : vector<1x192x64xbf16> to vector<192x64xbf16>
    %cst_116 = arith.constant dense<0.000000e+00> : vector<8x64xf32>
    %143 = tpu.matmul %140, %142, %cst_116 {dimension_numbers = #tpu.dot_dimension_numbers<[1], [0], [0], [1], [0, 0, 1, 1], [], []>} : vector<8x192xbf16>, vector<192x64xbf16>, vector<8x64xf32> -> vector<8x64xf32>
    %144 = arith.addf %124, %143 : vector<8x64xf32>
    %c3_117 = arith.constant 3 : index
    %c0_118 = arith.constant 0 : index
    %c0_119 = arith.constant 0 : index
    %145 = vector.load %arg9[%c3_117, %c0_118, %c0_119] : memref<7x8x224xbf16, #tpu.memory_space<vmem>>, vector<1x8x224xbf16>
    %146 = vector.shape_cast %145 : vector<1x8x224xbf16> to vector<8x224xbf16>
    %c0_120 = arith.constant 0 : index
    %c0_121 = arith.constant 0 : index
    %c0_122 = arith.constant 0 : index
    %147 = vector.load %arg3[%c0_120, %c0_121, %c0_122] : memref<2x224x192xbf16, #tpu.memory_space<vmem>>, vector<1x224x192xbf16>
    %148 = vector.shape_cast %147 : vector<1x224x192xbf16> to vector<224x192xbf16>
    %cst_123 = arith.constant dense<0.000000e+00> : vector<8x192xf32>
    %149 = tpu.matmul %146, %148, %cst_123 {dimension_numbers = #tpu.dot_dimension_numbers<[1], [0], [0], [1], [0, 0, 1, 1], [], []>} : vector<8x224xbf16>, vector<224x192xbf16>, vector<8x192xf32> -> vector<8x192xf32>
    %c4_124 = arith.constant 4 : index
    %c0_125 = arith.constant 0 : index
    %c0_126 = arith.constant 0 : index
    %150 = vector.load %arg9[%c4_124, %c0_125, %c0_126] : memref<7x8x224xbf16, #tpu.memory_space<vmem>>, vector<1x8x224xbf16>
    %151 = vector.shape_cast %150 : vector<1x8x224xbf16> to vector<8x224xbf16>
    %c1_127 = arith.constant 1 : index
    %c0_128 = arith.constant 0 : index
    %c0_129 = arith.constant 0 : index
    %152 = vector.load %arg3[%c1_127, %c0_128, %c0_129] : memref<2x224x192xbf16, #tpu.memory_space<vmem>>, vector<1x224x192xbf16>
    %153 = vector.shape_cast %152 : vector<1x224x192xbf16> to vector<224x192xbf16>
    %cst_130 = arith.constant dense<0.000000e+00> : vector<8x192xf32>
    %154 = tpu.matmul %151, %153, %cst_130 {dimension_numbers = #tpu.dot_dimension_numbers<[1], [0], [0], [1], [0, 0, 1, 1], [], []>} : vector<8x224xbf16>, vector<224x192xbf16>, vector<8x192xf32> -> vector<8x192xf32>
    %155 = arith.addf %149, %154 : vector<8x192xf32>
    %156 = vector.broadcast %2 : vector<1x192xf32> to vector<8x192xf32>
    %157 = arith.addf %155, %156 : vector<8x192xf32>
    %cst_131 = arith.constant 0.000000e+00 : f32
    %158 = vector.broadcast %cst_131 : f32 to vector<8x192xf32>
    %159 = arith.maximumf %157, %158 : vector<8x192xf32>
    %160 = arith.truncf %159 : vector<8x192xf32> to vector<8x192xbf16>
    %c3_132 = arith.constant 3 : index
    %c0_133 = arith.constant 0 : index
    %c0_134 = arith.constant 0 : index
    %161 = vector.load %arg4[%c3_132, %c0_133, %c0_134] : memref<6x192x64xbf16, #tpu.memory_space<vmem>>, vector<1x192x64xbf16>
    %162 = vector.shape_cast %161 : vector<1x192x64xbf16> to vector<192x64xbf16>
    %cst_135 = arith.constant dense<0.000000e+00> : vector<8x64xf32>
    %163 = tpu.matmul %160, %162, %cst_135 {dimension_numbers = #tpu.dot_dimension_numbers<[1], [0], [0], [1], [0, 0, 1, 1], [], []>} : vector<8x192xbf16>, vector<192x64xbf16>, vector<8x64xf32> -> vector<8x64xf32>
    %164 = arith.addf %144, %163 : vector<8x64xf32>
    %c4_136 = arith.constant 4 : index
    %c0_137 = arith.constant 0 : index
    %c0_138 = arith.constant 0 : index
    %165 = vector.load %arg9[%c4_136, %c0_137, %c0_138] : memref<7x8x224xbf16, #tpu.memory_space<vmem>>, vector<1x8x224xbf16>
    %166 = vector.shape_cast %165 : vector<1x8x224xbf16> to vector<8x224xbf16>
    %c0_139 = arith.constant 0 : index
    %c0_140 = arith.constant 0 : index
    %c0_141 = arith.constant 0 : index
    %167 = vector.load %arg3[%c0_139, %c0_140, %c0_141] : memref<2x224x192xbf16, #tpu.memory_space<vmem>>, vector<1x224x192xbf16>
    %168 = vector.shape_cast %167 : vector<1x224x192xbf16> to vector<224x192xbf16>
    %cst_142 = arith.constant dense<0.000000e+00> : vector<8x192xf32>
    %169 = tpu.matmul %166, %168, %cst_142 {dimension_numbers = #tpu.dot_dimension_numbers<[1], [0], [0], [1], [0, 0, 1, 1], [], []>} : vector<8x224xbf16>, vector<224x192xbf16>, vector<8x192xf32> -> vector<8x192xf32>
    %c5_143 = arith.constant 5 : index
    %c0_144 = arith.constant 0 : index
    %c0_145 = arith.constant 0 : index
    %170 = vector.load %arg9[%c5_143, %c0_144, %c0_145] : memref<7x8x224xbf16, #tpu.memory_space<vmem>>, vector<1x8x224xbf16>
    %171 = vector.shape_cast %170 : vector<1x8x224xbf16> to vector<8x224xbf16>
    %c1_146 = arith.constant 1 : index
    %c0_147 = arith.constant 0 : index
    %c0_148 = arith.constant 0 : index
    %172 = vector.load %arg3[%c1_146, %c0_147, %c0_148] : memref<2x224x192xbf16, #tpu.memory_space<vmem>>, vector<1x224x192xbf16>
    %173 = vector.shape_cast %172 : vector<1x224x192xbf16> to vector<224x192xbf16>
    %cst_149 = arith.constant dense<0.000000e+00> : vector<8x192xf32>
    %174 = tpu.matmul %171, %173, %cst_149 {dimension_numbers = #tpu.dot_dimension_numbers<[1], [0], [0], [1], [0, 0, 1, 1], [], []>} : vector<8x224xbf16>, vector<224x192xbf16>, vector<8x192xf32> -> vector<8x192xf32>
    %175 = arith.addf %169, %174 : vector<8x192xf32>
    %176 = vector.broadcast %2 : vector<1x192xf32> to vector<8x192xf32>
    %177 = arith.addf %175, %176 : vector<8x192xf32>
    %cst_150 = arith.constant 0.000000e+00 : f32
    %178 = vector.broadcast %cst_150 : f32 to vector<8x192xf32>
    %179 = arith.maximumf %177, %178 : vector<8x192xf32>
    %180 = arith.truncf %179 : vector<8x192xf32> to vector<8x192xbf16>
    %c4_151 = arith.constant 4 : index
    %c0_152 = arith.constant 0 : index
    %c0_153 = arith.constant 0 : index
    %181 = vector.load %arg4[%c4_151, %c0_152, %c0_153] : memref<6x192x64xbf16, #tpu.memory_space<vmem>>, vector<1x192x64xbf16>
    %182 = vector.shape_cast %181 : vector<1x192x64xbf16> to vector<192x64xbf16>
    %cst_154 = arith.constant dense<0.000000e+00> : vector<8x64xf32>
    %183 = tpu.matmul %180, %182, %cst_154 {dimension_numbers = #tpu.dot_dimension_numbers<[1], [0], [0], [1], [0, 0, 1, 1], [], []>} : vector<8x192xbf16>, vector<192x64xbf16>, vector<8x64xf32> -> vector<8x64xf32>
    %184 = arith.addf %164, %183 : vector<8x64xf32>
    %c5_155 = arith.constant 5 : index
    %c0_156 = arith.constant 0 : index
    %c0_157 = arith.constant 0 : index
    %185 = vector.load %arg9[%c5_155, %c0_156, %c0_157] : memref<7x8x224xbf16, #tpu.memory_space<vmem>>, vector<1x8x224xbf16>
    %186 = vector.shape_cast %185 : vector<1x8x224xbf16> to vector<8x224xbf16>
    %c0_158 = arith.constant 0 : index
    %c0_159 = arith.constant 0 : index
    %c0_160 = arith.constant 0 : index
    %187 = vector.load %arg3[%c0_158, %c0_159, %c0_160] : memref<2x224x192xbf16, #tpu.memory_space<vmem>>, vector<1x224x192xbf16>
    %188 = vector.shape_cast %187 : vector<1x224x192xbf16> to vector<224x192xbf16>
    %cst_161 = arith.constant dense<0.000000e+00> : vector<8x192xf32>
    %189 = tpu.matmul %186, %188, %cst_161 {dimension_numbers = #tpu.dot_dimension_numbers<[1], [0], [0], [1], [0, 0, 1, 1], [], []>} : vector<8x224xbf16>, vector<224x192xbf16>, vector<8x192xf32> -> vector<8x192xf32>
    %c6_162 = arith.constant 6 : index
    %c0_163 = arith.constant 0 : index
    %c0_164 = arith.constant 0 : index
    %190 = vector.load %arg9[%c6_162, %c0_163, %c0_164] : memref<7x8x224xbf16, #tpu.memory_space<vmem>>, vector<1x8x224xbf16>
    %191 = vector.shape_cast %190 : vector<1x8x224xbf16> to vector<8x224xbf16>
    %c1_165 = arith.constant 1 : index
    %c0_166 = arith.constant 0 : index
    %c0_167 = arith.constant 0 : index
    %192 = vector.load %arg3[%c1_165, %c0_166, %c0_167] : memref<2x224x192xbf16, #tpu.memory_space<vmem>>, vector<1x224x192xbf16>
    %193 = vector.shape_cast %192 : vector<1x224x192xbf16> to vector<224x192xbf16>
    %cst_168 = arith.constant dense<0.000000e+00> : vector<8x192xf32>
    %194 = tpu.matmul %191, %193, %cst_168 {dimension_numbers = #tpu.dot_dimension_numbers<[1], [0], [0], [1], [0, 0, 1, 1], [], []>} : vector<8x224xbf16>, vector<224x192xbf16>, vector<8x192xf32> -> vector<8x192xf32>
    %195 = arith.addf %189, %194 : vector<8x192xf32>
    %196 = vector.broadcast %2 : vector<1x192xf32> to vector<8x192xf32>
    %197 = arith.addf %195, %196 : vector<8x192xf32>
    %cst_169 = arith.constant 0.000000e+00 : f32
    %198 = vector.broadcast %cst_169 : f32 to vector<8x192xf32>
    %199 = arith.maximumf %197, %198 : vector<8x192xf32>
    %200 = arith.truncf %199 : vector<8x192xf32> to vector<8x192xbf16>
    %c5_170 = arith.constant 5 : index
    %c0_171 = arith.constant 0 : index
    %c0_172 = arith.constant 0 : index
    %201 = vector.load %arg4[%c5_170, %c0_171, %c0_172] : memref<6x192x64xbf16, #tpu.memory_space<vmem>>, vector<1x192x64xbf16>
    %202 = vector.shape_cast %201 : vector<1x192x64xbf16> to vector<192x64xbf16>
    %cst_173 = arith.constant dense<0.000000e+00> : vector<8x64xf32>
    %203 = tpu.matmul %200, %202, %cst_173 {dimension_numbers = #tpu.dot_dimension_numbers<[1], [0], [0], [1], [0, 0, 1, 1], [], []>} : vector<8x192xbf16>, vector<192x64xbf16>, vector<8x64xf32> -> vector<8x64xf32>
    %204 = arith.addf %184, %203 : vector<8x64xf32>
    %205 = vector.broadcast %3 : vector<1x64xf32> to vector<8x64xf32>
    %206 = arith.addf %204, %205 : vector<8x64xf32>
    %cst_174 = arith.constant 0.000000e+00 : f32
    %207 = vector.broadcast %cst_174 : f32 to vector<8x64xf32>
    %208 = arith.maximumf %206, %207 : vector<8x64xf32>
    %209 = arith.truncf %208 : vector<8x64xf32> to vector<8x64xbf16>
    %c0_175 = arith.constant 0 : index
    %c0_176 = arith.constant 0 : index
    %210 = vector.load %arg5[%c0_175, %c0_176] : memref<192x128xbf16, #tpu.memory_space<vmem>>, vector<64x128xbf16>
    %cst_177 = arith.constant dense<0.000000e+00> : vector<8x128xf32>
    %211 = tpu.matmul %209, %210, %cst_177 {dimension_numbers = #tpu.dot_dimension_numbers<[1], [0], [0], [1], [0, 0, 1, 1], [], []>} : vector<8x64xbf16>, vector<64x128xbf16>, vector<8x128xf32> -> vector<8x128xf32>
    %212 = vector.broadcast %4 : vector<1x128xf32> to vector<8x128xf32>
    %213 = arith.addf %211, %212 : vector<8x128xf32>
    %cst_178 = arith.constant 0.000000e+00 : f32
    %214 = vector.broadcast %cst_178 : f32 to vector<8x128xf32>
    %215 = arith.maximumf %213, %214 : vector<8x128xf32>
    %c64 = arith.constant 64 : index
    %c0_179 = arith.constant 0 : index
    %216 = vector.load %arg5[%c64, %c0_179] : memref<192x128xbf16, #tpu.memory_space<vmem>>, vector<128x128xbf16>
    %217 = arith.truncf %215 : vector<8x128xf32> to vector<8x128xbf16>
    %cst_180 = arith.constant dense<0.000000e+00> : vector<8x128xf32>
    %218 = tpu.matmul %217, %216, %cst_180 {dimension_numbers = #tpu.dot_dimension_numbers<[1], [0], [0], [1], [0, 0, 1, 1], [], []>} : vector<8x128xbf16>, vector<128x128xbf16>, vector<8x128xf32> -> vector<8x128xf32>
    %219 = vector.broadcast %5 : vector<1x128xf32> to vector<8x128xf32>
    %220 = arith.addf %218, %219 : vector<8x128xf32>
    %c0_181 = arith.constant 0 : index
    %c0_182 = arith.constant 0 : index
    %221 = vector.load %arg7[%c0_181, %c0_182] : memref<8x128xf32, #tpu.memory_space<vmem>>, vector<8x128xf32>
    %cst_183 = arith.constant 0.000000e+00 : f32
    %222 = vector.broadcast %cst_183 : f32 to vector<8x128xf32>
    %223 = arith.cmpf oeq, %221, %222 : vector<8x128xf32>
    %cst_184 = arith.constant 0xFF800000 : f32
    %224 = vector.broadcast %cst_184 : f32 to vector<8x128xf32>
    %225 = arith.select %223, %224, %220 : vector<8x128xi1>, vector<8x128xf32>
    %c0_185 = arith.constant 0 : index
    %c0_186 = arith.constant 0 : index
    %226 = vector.load %arg8[%c0_185, %c0_186] : memref<8x128xf32, #tpu.memory_space<vmem>>, vector<8x128xf32>
    tpu.vector_store %arg8[%c0_185, %c0_186], %225 {strides = array<i32>} : memref<8x128xf32, #tpu.memory_space<vmem>>, vector<8x128xf32>,
    return
  }
  func.func @transform_0(%arg0: i32) -> (i32, i32, i32, i32) {
    %c0_i32 = arith.constant 0 : i32
    %c0_i32_0 = arith.constant 0 : i32
    %c0_i32_1 = arith.constant 0 : i32
    %c0_i32_2 = arith.constant 0 : i32
    return %arg0, %c0_i32, %c0_i32_0, %c0_i32_1 : i32, i32, i32, i32
  }
  func.func @transform_1(%arg0: i32) -> (i32, i32) {
    %c0_i32 = arith.constant 0 : i32
    %c0_i32_0 = arith.constant 0 : i32
    %c0_i32_1 = arith.constant 0 : i32
    return %c0_i32, %c0_i32_0 : i32, i32
  }
  func.func @transform_2(%arg0: i32) -> (i32, i32, i32) {
    %c0_i32 = arith.constant 0 : i32
    %c0_i32_0 = arith.constant 0 : i32
    %c0_i32_1 = arith.constant 0 : i32
    %c0_i32_2 = arith.constant 0 : i32
    return %c0_i32, %c0_i32_0, %c0_i32_1 : i32, i32, i32
  }
  func.func @transform_3(%arg0: i32) -> (i32, i32, i32) {
    %c0_i32 = arith.constant 0 : i32
    %c0_i32_0 = arith.constant 0 : i32
    %c0_i32_1 = arith.constant 0 : i32
    %c0_i32_2 = arith.constant 0 : i32
    return %c0_i32, %c0_i32_0, %c0_i32_1 : i32, i32, i32
  }
  func.func @transform_4(%arg0: i32) -> (i32, i32) {
    %c0_i32 = arith.constant 0 : i32
    %c0_i32_0 = arith.constant 0 : i32
    %c0_i32_1 = arith.constant 0 : i32
    return %c0_i32, %c0_i32_0 : i32, i32
  }
  func.func @transform_5(%arg0: i32) -> (i32, i32) {
    %c0_i32 = arith.constant 0 : i32
    %c0_i32_0 = arith.constant 0 : i32
    %c0_i32_1 = arith.constant 0 : i32
    return %c0_i32, %c0_i32_0 : i32, i32
  }
  func.func @transform_6(%arg0: i32) -> (i32, i32) {
    %c0_i32 = arith.constant 0 : i32
    %c0_i32_0 = arith.constant 0 : i32
    return %arg0, %c0_i32 : i32, i32
  }
  func.func @transform_7(%arg0: i32) -> (i32, i32) {
    %c0_i32 = arith.constant 0 : i32
    %c0_i32_0 = arith.constant 0 : i32
    return %arg0, %c0_i32 : i32, i32
  }
}

</mosaic_0001>

<bundles_post_ra>
// kernel: tpu_custom_call.1
= control target key start
LH: loop header
LB: loop body
LE: loop exit
PB: predicated region body
PF: predicated region fallthrough
CT: control target
= control target key end

     0   :  { %v4662_v2 = vmov 0   ;;  %vm63_vm0 = vcmask 261120   ;;  %s4654_s0 = inlined_call_operand.vmem [shape: bf16[1,7,8,32], index: 0, kind: input, shape index: {}]   ;;  %s4655_s1 = inlined_call_operand.vmem [shape: bf16[32,224], index: 1, kind: input, shape index: {}]   ;;  %s4656_s2 = inlined_call_operand.vmem [shape: bf16[2,224,192], index: 2, kind: input, shape index: {}]   ;;  %s4657_s3 = inlined_call_operand.vmem [shape: bf16[6,192,64], index: 3, kind: input, shape index: {}]   ;;  %s4658_s4 = inlined_call_operand.vmem [shape: bf16[192,128], index: 4, kind: input, shape index: {}]   ;;  %s4659_s5 = inlined_call_operand.vmem [shape: f32[8,256], index: 5, kind: input, shape index: {}]   ;;  %s4660_s6 = inlined_call_operand.vmem [shape: f32[8,128], index: 6, kind: input, shape index: {}]   ;;  %s4661_s7 = inlined_call_operand.hbm [shape: f32[8,128], index: 7, kind: output, shape index: {}]  }
   0x1   :  { %v2874_v0 = vld [vmem:[%s4655_s1 + $0x14] ss:$8 sps:$4 sm:$0xff]   ;;  %v2876_v1 = vld [vmem:[%s4655_s1 + $0x10] ss:$8 sps:$4 sm:$0xff]   ;;  %99 = vmatprep.mubr.bf16.mxu1 %v4662_v2  ;;  %217 = vmatprep.mubr.bf16.mxu0 %v4662_v2  ;;  %v2877_v3 = vld [vmem:[%s4655_s1 + $0x4] ss:$8 sps:$4 sm:$0xff]  }
   0x2   :  { %79 = vmatprep.subr.bf16.mxu1 %v2874_v0  ;;  %197 = vmatprep.subr.bf16.mxu0 %v2874_v0  ;;  %v2879_v4 = vld [vmem:[%s4655_s1] ss:$8 sps:$4 sm:$0xff]   ;;  %v2478_v7 = vld [vmem:[%s4654_s0 + $0x4] sm:$0xf]  ;;  %v2487_v8 = vld [vmem:[%s4654_s0 + $0x10] sm:$0xf] }
   0x3   :  { %80 = vmatpush1.bf16.msra.mxu1 %v2876_v1  ;;  %198 = vmatpush1.bf16.msra.mxu0 %v2876_v1  ;;  %v34_v5 = vld [vmem:[%s4654_s0] sm:$0xf]  ;;  %v2481_v6 = vld [vmem:[%s4654_s0 + $0x8] sm:$0xf]  ;;  %v3221_v9 = vld [vmem:[%s4656_s2 + $0x74] ss:$8 sps:$4 sm:$0xff]  }
   0x4   :  { %81 = vmatprep.subr.bf16.mxu1 %v2877_v3  ;;  %199 = vmatprep.subr.bf16.mxu0 %v2877_v3  ;;  %v2484_v10 = vld [vmem:[%s4654_s0 + $0xc] sm:$0xf]  ;;  %v2493_v11 = vld [vmem:[%s4654_s0 + $0x18] sm:$0xf]  ;;  %v3246_v14 = vld [vmem:[%s4656_s2 + $0x60] ss:$8 sps:$4 sm:$0xff]  }
   0x5   :  { %v3233_v12 = vld [vmem:[%s4656_s2 + $0x70] ss:$8 sps:$4 sm:$0xff]   ;;  %v3239_v13 = vld [vmem:[%s4656_s2 + $0x64] ss:$8 sps:$4 sm:$0xff]   ;;  %v3252_v15 = vld [vmem:[%s4656_s2 + $0x154] ss:$8 sps:$4 sm:$0xff]  }
   0x6   :  { %v3257_v16 = vld [vmem:[%s4656_s2 + $0x54] ss:$8 sps:$4 sm:$0xff]   ;;  %v3267_v18 = vld [vmem:[%s4656_s2 + $0x150] ss:$8 sps:$4 sm:$0xff]   ;;  %v3277_v20 = vld [vmem:[%s4656_s2 + $0x144] ss:$8 sps:$4 sm:$0xff]  }
   0x7   :  { %82 = vmatpush1.bf16.msra.mxu1 %v2879_v4  ;;  %200 = vmatpush1.bf16.msra.mxu0 %v2879_v4  ;;  %v2490_v17 = vld [vmem:[%s4654_s0 + $0x14] sm:$0xf]  ;;  %v3272_v19 = vld [vmem:[%s4656_s2 + $0x50] ss:$8 sps:$4 sm:$0xff]   ;;  %v3282_v21 = vld [vmem:[%s4656_s2 + $0x44] ss:$8 sps:$4 sm:$0xff]  }
   0x8   :  { %139 = vmatprep.subr.bf16.mxu1 %v2874_v0  ;;  %313 = vmatprep.subr.bf16.mxu0 %v2874_v0  ;;  %v3290_v22 = vld [vmem:[%s4656_s2 + $0x140] ss:$8 sps:$4 sm:$0xff]   ;;  %v3301_v24 = vld [vmem:[%s4656_s2 + $0x134] ss:$8 sps:$4 sm:$0xff]   ;;  %v3315_v26 = vld [vmem:[%s4656_s2 + $0x130] ss:$8 sps:$4 sm:$0xff]  }
   0x9   :  { %v3296_v23 = vld [vmem:[%s4656_s2 + $0x40] ss:$8 sps:$4 sm:$0xff]   ;;  %v3307_v25 = vld [vmem:[%s4656_s2 + $0x34] ss:$8 sps:$4 sm:$0xff]   ;;  %v3320_v27 = vld [vmem:[%s4656_s2 + $0x30] ss:$8 sps:$4 sm:$0xff]  }
   0xa   :  { %2476 = vmatmul.mubr.msk.bf16.vlgmr.msra.gmra.mxu1 %vm63_vm0, %v34_v5  ;;  %2482 = vmatmul.mubr.msk.bf16.vlgmr.msra.gmra.mxu0 %vm63_vm0, %v2481_v6  ;;  %v3325_v28 = vld [vmem:[%s4656_s2 + $0x124] ss:$8 sps:$4 sm:$0xff]   ;;  %v3339_v30 = vld [vmem:[%s4656_s2 + $0x120] ss:$8 sps:$4 sm:$0xff]   ;;  %v3349_v32 = vld [vmem:[%s4656_s2 + $0x114] ss:$8 sps:$4 sm:$0xff]  }
   0xb   :  { %140 = vmatpush1.bf16.msra.mxu1 %v2876_v1  ;;  %159 = vmatprep.mubr.bf16.mxu1 %v4662_v2  ;;  %v3331_v29 = vld [vmem:[%s4656_s2 + $0x24] ss:$8 sps:$4 sm:$0xff]   ;;  %v3344_v31 = vld [vmem:[%s4656_s2 + $0x20] ss:$8 sps:$4 sm:$0xff]   ;;  %v3355_v33 = vld [vmem:[%s4656_s2 + $0x14] ss:$8 sps:$4 sm:$0xff]  }
   0xc   :  { %141 = vmatprep.subr.bf16.mxu1 %v2877_v3  ;;  %314 = vmatpush1.bf16.msra.mxu0 %v2876_v1  ;;  %v3363_v34 = vld [vmem:[%s4656_s2 + $0x110] ss:$8 sps:$4 sm:$0xff]   ;;  %v3373_v36 = vld [vmem:[%s4656_s2 + $0x104] ss:$8 sps:$4 sm:$0xff]   ;;  %v3387_v38 = vld [vmem:[%s4656_s2 + $0x100] ss:$8 sps:$4 sm:$0xff]  }
   0xd   :  { %315 = vmatprep.subr.bf16.mxu0 %v2877_v3  ;;  %333 = vmatprep.mubr.bf16.mxu0 %v4662_v2  ;;  %v3368_v35 = vld [vmem:[%s4656_s2 + $0x10] ss:$8 sps:$4 sm:$0xff]   ;;  %v3379_v37 = vld [vmem:[%s4656_s2 + $0x4] ss:$8 sps:$4 sm:$0xff]   ;;  %v3392_v39 = vld [vmem:[%s4656_s2] ss:$8 sps:$4 sm:$0xff]  }
   0xe   :  { %v3397_v40 = vld [vmem:[%s4656_s2 + $0xf4] ss:$8 sps:$4 sm:$0xff]   ;;  %v3411_v42 = vld [vmem:[%s4656_s2 + $0xf0] ss:$8 sps:$4 sm:$0xff]   ;;  %v3421_v44 = vld [vmem:[%s4656_s2 + $0xe4] ss:$8 sps:$4 sm:$0xff]  }
   0xf   :  { %142 = vmatpush1.bf16.msra.mxu1 %v2879_v4  ;;  %v3403_v41 = vld [vmem:[%s4656_s2 + $0xd4] ss:$8 sps:$4 sm:$0xff]   ;;  %v3416_v43 = vld [vmem:[%s4656_s2 + $0xd0] ss:$8 sps:$4 sm:$0xff]   ;;  %v3427_v45 = vld [vmem:[%s4656_s2 + $0xc4] ss:$8 sps:$4 sm:$0xff]  }
  0x10   :  { %255 = vmatprep.subr.bf16.mxu1 %v2874_v0  ;;  %316 = vmatpush1.bf16.msra.mxu0 %v2879_v4  ;;  %v3439_v46 = vld [vmem:[%s4656_s2 + $0xe0] ss:$8 sps:$4 sm:$0xff]   ;;  %v3451_v48 = vld [vmem:[%s4656_s2 + $0x1b4] ss:$8 sps:$4 sm:$0xff]   ;;  %v3461_v50 = vld [vmem:[%s4656_s2 + $0x1b0] ss:$8 sps:$4 sm:$0xff]  }
  0x11   :  { %429 = vmatprep.subr.bf16.mxu0 %v2874_v0  ;;  %v3444_v47 = vld [vmem:[%s4656_s2 + $0xc0] ss:$8 sps:$4 sm:$0xff]   ;;  %v3456_v49 = vld [vmem:[%s4656_s2 + $0xb4] ss:$8 sps:$4 sm:$0xff]   ;;  %v3466_v51 = vld [vmem:[%s4656_s2 + $0xb0] ss:$8 sps:$4 sm:$0xff]  }
  0x12   :  { %2479 = vmatmul.mubr.msk.bf16.vlgmr.msra.gmra.mxu1 %vm63_vm0, %v2478_v7  ;;  %v3475_v52 = vld [vmem:[%s4656_s2 + $0x1a4] ss:$8 sps:$4 sm:$0xff]   ;;  %v3485_v54 = vld [vmem:[%s4656_s2 + $0x1a0] ss:$8 sps:$4 sm:$0xff]   ;;  %v3499_v56 = vld [vmem:[%s4656_s2 + $0x194] ss:$8 sps:$4 sm:$0xff]  }
  0x13   :  { %256 = vmatpush1.bf16.msra.mxu1 %v2876_v1  ;;  %2488 = vmatmul.mubr.msk.bf16.vlgmr.msra.gmra.mxu0 %vm63_vm0, %v2487_v8  ;;  %v3480_v53 = vld [vmem:[%s4656_s2 + $0xa4] ss:$8 sps:$4 sm:$0xff]   ;;  %v3490_v55 = vld [vmem:[%s4656_s2 + $0xa0] ss:$8 sps:$4 sm:$0xff]   ;;  %4708 = vst [vmem:[#allocation6_spill] sm:$0xff] %v3499_v56 }
  0x14   :  { %257 = vmatprep.subr.bf16.mxu1 %v2877_v3  ;;  %430 = vmatpush1.bf16.msra.mxu0 %v2876_v1  ;;  %v3504_v57 = vld [vmem:[%s4656_s2 + $0x94] ss:$8 sps:$4 sm:$0xff]   ;;  %v3509_v58 = vld [vmem:[%s4656_s2 + $0x190] ss:$8 sps:$4 sm:$0xff]   ;;  %v3523_v60 = vld [vmem:[%s4656_s2 + $0x184] ss:$8 sps:$4 sm:$0xff]  }
  0x15   :  { %275 = vmatprep.mubr.bf16.mxu1 %v4662_v2  ;;  %431 = vmatprep.subr.bf16.mxu0 %v2877_v3  ;;  %4709 = vst [vmem:[#allocation7_spill] sm:$0xff] %v3504_v57  ;;  %4710 = vst [vmem:[#allocation8_spill] sm:$0xff] %v3509_v58  ;;  %v3514_v59 = vld [vmem:[%s4656_s2 + $0x90] ss:$8 sps:$4 sm:$0xff]   ;;  %v3528_v61 = vld [vmem:[%s4656_s2 + $0x84] ss:$8 sps:$4 sm:$0xff]  }
  0x16   :  { %449 = vmatprep.mubr.bf16.mxu0 %v4662_v2  ;;  %4711 = vst [vmem:[#allocation9_spill] sm:$0xff] %v3514_v59  ;;  %4712 = vst [vmem:[#allocation10_spill] sm:$0xff] %v3523_v60  ;;  %v3533_v62 = vld [vmem:[%s4656_s2 + $0x180] ss:$8 sps:$4 sm:$0xff]  }
  0x17   :  { %258 = vmatpush1.bf16.msra.mxu1 %v2879_v4  ;;  %4713 = vst [vmem:[#allocation11_spill] sm:$0xff] %v3528_v61  ;;  %4714 = vst [vmem:[#allocation12_spill] sm:$0xff] %v3533_v62  ;;  %v3538_v63 = vld [vmem:[%s4656_s2 + $0x80] ss:$8 sps:$4 sm:$0xff]  }
  0x18   :  { %371 = vmatprep.subr.bf16.mxu1 %v2874_v0  ;;  %432 = vmatpush1.bf16.msra.mxu0 %v2879_v4  ;;  %4715 = vst [vmem:[#allocation13_spill] sm:$0xff] %v3538_v63  ;;  %v3547_v0 = vld [vmem:[%s4656_s2 + $0x174] ss:$8 sps:$4 sm:$0xff]  }
  0x19   :  { %869 = vmatprep.subr.bf16.mxu0 %v3221_v9  ;;  %4716 = vst [vmem:[#allocation14_spill] sm:$0xff] %v3547_v0 }
  0x1a   :  { %2485 = vmatmul.mubr.msk.bf16.vlgmr.msra.gmra.mxu1 %vm63_vm0, %v2484_v10 }
  0x1b   :  { %372 = vmatpush1.bf16.msra.mxu1 %v2876_v1  ;;  %2494 = vmatmul.mubr.msk.bf16.vlgmr.msra.gmra.mxu0 %vm63_vm0, %v2493_v11  ;;  %v3553_v1 = vld [vmem:[%s4656_s2 + $0x170] ss:$8 sps:$4 sm:$0xff]  }
  0x1c   :  { %373 = vmatprep.subr.bf16.mxu1 %v2877_v3  ;;  %870 = vmatpush1.bf16.msra.mxu0 %v3233_v12  ;;  %4717 = vst [vmem:[#allocation15_spill] sm:$0xff] %v3553_v1  ;;  %v3560_v3 = vld [vmem:[%s4656_s2 + $0x164] ss:$8 sps:$4 sm:$0xff]  }
  0x1d   :  { %391 = vmatprep.mubr.bf16.mxu1 %v4662_v2  ;;  %871 = vmatprep.subr.bf16.mxu0 %v3239_v13  ;;  %4718 = vst [vmem:[#allocation16_spill] sm:$0xff] %v3560_v3 }
  0x1f   :  { %374 = vmatpush1.bf16.msra.mxu1 %v2879_v4  ;;  %v3565_v4 = vld [vmem:[%s4656_s2 + $0x160] ss:$8 sps:$4 sm:$0xff]  }
  0x20   :  { %872 = vmatpush1.bf16.msra.mxu0 %v3246_v14  ;;  %679 = vmatprep.subr.bf16.mxu1 %v3252_v15  ;;  %4719 = vst [vmem:[#allocation17_spill] sm:$0xff] %v3565_v4 }
  0x21   :  { %873 = vmatprep.subr.bf16.mxu0 %v3257_v16 }
  0x22   :  { %2491 = vmatmul.mubr.msk.bf16.vlgmr.msra.gmra.mxu1 %vm63_vm0, %v2490_v17 }
  0x23   :  { %680 = vmatpush1.bf16.msra.mxu1 %v3267_v18 }
  0x24   :  { %874 = vmatpush1.bf16.msra.mxu0 %v3272_v19  ;;  %681 = vmatprep.subr.bf16.mxu1 %v3277_v20 }
  0x25   :  { %875 = vmatprep.subr.bf16.mxu0 %v3282_v21 }
  0x27   :  { %682 = vmatpush1.bf16.msra.mxu1 %v3290_v22 }
  0x28   :  { %876 = vmatpush1.bf16.msra.mxu0 %v3296_v23  ;;  %683 = vmatprep.subr.bf16.mxu1 %v3301_v24 }
  0x29   :  { %877 = vmatprep.subr.bf16.mxu0 %v3307_v25 }
  0x2b   :  { %684 = vmatpush1.bf16.msra.mxu1 %v3315_v26 }
  0x2c   :  { %878 = vmatpush1.bf16.msra.mxu0 %v3320_v27  ;;  %685 = vmatprep.subr.bf16.mxu1 %v3325_v28 }
  0x2d   :  { %879 = vmatprep.subr.bf16.mxu0 %v3331_v29 }
  0x2f   :  { %686 = vmatpush1.bf16.msra.mxu1 %v3339_v30 }
  0x30   :  { %880 = vmatpush1.bf16.msra.mxu0 %v3344_v31  ;;  %687 = vmatprep.subr.bf16.mxu1 %v3349_v32 }
  0x31   :  { %881 = vmatprep.subr.bf16.mxu0 %v3355_v33 }
  0x33   :  { %688 = vmatpush1.bf16.msra.mxu1 %v3363_v34 }
  0x34   :  { %882 = vmatpush1.bf16.msra.mxu0 %v3368_v35  ;;  %689 = vmatprep.subr.bf16.mxu1 %v3373_v36 }
  0x35   :  { %883 = vmatprep.subr.bf16.mxu0 %v3379_v37 }
  0x37   :  { %690 = vmatpush1.bf16.msra.mxu1 %v3387_v38 }
  0x38   :  { %884 = vmatpush1.bf16.msra.mxu0 %v3392_v39  ;;  %691 = vmatprep.subr.bf16.mxu1 %v3397_v40 }
  0x39   :  { %889 = vmatprep.subr.bf16.mxu0 %v3403_v41 }
  0x3b   :  { %692 = vmatpush1.bf16.msra.mxu1 %v3411_v42 }
  0x3c   :  { %890 = vmatpush2.bf16.msra.mxu0 %v3416_v43  ;;  %693 = vmatprep.subr.bf16.mxu1 %v3421_v44 }
  0x3d   :  { %891 = vmatprep.subr.bf16.mxu0 %v3427_v45 }
  0x3f   :  { %694 = vmatpush1.bf16.msra.mxu1 %v3439_v46 }
  0x40   :  { %892 = vmatpush2.bf16.msra.mxu0 %v3444_v47  ;;  %699 = vmatprep.subr.bf16.mxu1 %v3451_v48 }
  0x41   :  { %893 = vmatprep.subr.bf16.mxu0 %v3456_v49 }
  0x43   :  { %700 = vmatpush2.bf16.msra.mxu1 %v3461_v50 }
  0x44   :  { %894 = vmatpush2.bf16.msra.mxu0 %v3466_v51  ;;  %701 = vmatprep.subr.bf16.mxu1 %v3475_v52 }
  0x45   :  { %895 = vmatprep.subr.bf16.mxu0 %v3480_v53 }
  0x47   :  { %702 = vmatpush2.bf16.msra.mxu1 %v3485_v54 }
  0x48   :  { %896 = vmatpush2.bf16.msra.mxu0 %v3490_v55  ;;  %703 = vmatprep.subr.bf16.mxu1 %v3499_v56 }
  0x49   :  { %897 = vmatprep.subr.bf16.mxu0 %v3504_v57 }
  0x4b   :  { %704 = vmatpush2.bf16.msra.mxu1 %v3509_v58 }
  0x4c   :  { %898 = vmatpush2.bf16.msra.mxu0 %v3514_v59  ;;  %705 = vmatprep.subr.bf16.mxu1 %v3523_v60 }
  0x4d   :  { %899 = vmatprep.subr.bf16.mxu0 %v3528_v61 }
  0x4f   :  { %706 = vmatpush2.bf16.msra.mxu1 %v3533_v62 }
  0x50   :  { %900 = vmatpush2.bf16.msra.mxu0 %v3538_v63  ;;  %707 = vmatprep.subr.bf16.mxu1 %v3547_v0 }
  0x51   :  { %999 = vmatprep.subr.bf16.mxu0 %v3221_v9 }
  0x53   :  { %708 = vmatpush2.bf16.msra.mxu1 %v3553_v1 }
  0x54   :  { %709 = vmatprep.subr.bf16.mxu1 %v3560_v3 }
  0x57   :  { %710 = vmatpush2.bf16.msra.mxu1 %v3565_v4 }
  0x58   :  { %958 = vmatprep.subr.bf16.mxu1 %v3252_v15 }
  0x59   :  { %12 = vsyncpa [#allocation4], 0  ;;  %v35_v5 = vlaneseq  ;;  %v3576_v8 = vld [vmem:[%s4659_s5] sm:$0xff]  ;;  %v3581_v9 = vld [vmem:[%s4659_s5 + $0x8] sm:$0xff]  ;;  %vm118_vm1 = vcmask 1043456   ;;  %vm119_vm2 = vcmask 785412  }
  0x5a   :  { %4721 = vst [vmem:[#allocation19_spill] sm:$0xff] %v3576_v8  ;;  %4722 = vst [vmem:[#allocation20_spill] sm:$0xff] %v3581_v9  ;;  %vm675_vm4 = vcmask 785408   ;;  %vm1143_vm5 = vcmask 523264   ;;  %vm3143_vm6 = vmmov 0  }
  0x5b   :  { %v3570_v6 = vshrl.u32 %v35_v5, 7  ;;  %vm3593_vm3 = vmor %vm119_vm2, %vm118_vm1 }
  0x5d   :  { %4720 = vst [vmem:[#allocation18_spill] sm:$0xff] %v3570_v6  ;;  %v37_v7 = vsub.s32 0, %v3570_v6 }
  0x5f   :  { %v3584_v10 = vrot.slane %v3576_v8, %v37_v7  ;;  %v3587_v11 = vrot.slane %v3581_v9, %v37_v7 }
  0xca   :  { %v101_v15 = vpop.f32.mrf.mxu1  ;;  %v219_v17 = vpop.f32.mrf.mxu0 }
  0xcb   :  { %v102_v5 = vadd.f32 %v101_v15, %v3584_v10  ;;  %v220_v2 = vadd.f32 %v219_v17, %v3584_v10 }
  0xcc   :  { %v103_v6 = vpop.f32.mrf.mxu1  ;;  %v221_v4 = vpop.f32.mrf.mxu0 }
  0xcd   :  { %v104_v3 = vadd.f32 %v103_v6, %v3587_v11  ;;  %v226_v1 = vmax.f32 %v220_v2, 0.0  ;;  %v222_v0 = vadd.f32 %v221_v4, %v3587_v11  ;;  %v108_v62 = vmax.f32 %v102_v5, 0.0 }
  0xce   :  { %v105_v8 = vpop.f32.mrf.mxu1  ;;  %v223_v63 = vpop.f32.mrf.mxu0 }
  0xcf   :  { %v109_v7 = vmax.f32 %v104_v3, 0.0  ;;  %v227_v9 = vmax.f32 %v222_v0, 0.0 }
  0xd0   :  { %v106_v15 = vpop.f32.mrf.mxu1  ;;  %v224_v17 = vpop.f32.mrf.mxu0 }
  0xd1   :  { %v2817_v60 = vpack.c.bf16 %v109_v7, %v108_v62  ;;  %v2819_v59 = vpack.c.bf16 %v227_v9, %v226_v1 }
  0xd2   :  { %v161_v58 = vpop.f32.mrf.mxu1 }
  0xd3   :  { %121 = vst.msk [vmem:[#allocation2] sm:$0xff] %vm3593_vm3, %v2817_v60  ;;  %v162_v2 = vadd.f32 %v161_v58, %v3584_v10  ;;  %237 = vst.msk [vmem:[#allocation2 + $0x10] sm:$0xff] %vm3593_vm3, %v2819_v59  ;;  %v335_v63 = vpop.f32.mrf.mxu0 }
  0xd4   :  { %v163_v3 = vpop.f32.mrf.mxu1  ;;  %v336_v0 = vadd.f32 %v335_v63, %v3584_v10 }
  0xd5   :  { %v164_v4 = vadd.f32 %v163_v3, %v3587_v11  ;;  %v337_v6 = vpop.f32.mrf.mxu0  ;;  %v168_v1 = vmax.f32 %v162_v2, 0.0 }
  0xd6   :  { %v165_v8 = vpop.f32.mrf.mxu1  ;;  %v342_v5 = vmax.f32 %v336_v0, 0.0  ;;  %v338_v62 = vadd.f32 %v337_v6, %v3587_v11 }
  0xd7   :  { %v169_v9 = vmax.f32 %v164_v4, 0.0  ;;  %v339_v7 = vpop.f32.mrf.mxu0 }
  0xd8   :  { %v166_v60 = vpop.f32.mrf.mxu1  ;;  %v343_v15 = vmax.f32 %v338_v62, 0.0 }
  0xd9   :  { %v2818_v58 = vpack.c.bf16 %v169_v9, %v168_v1  ;;  %v340_v17 = vpop.f32.mrf.mxu0 }
  0xda   :  { %v470_v57 = vld [vmem:[#allocation2] sm:$0xff]  ;;  %v277_v59 = vpop.f32.mrf.mxu1  ;;  %v2821_v56 = vpack.c.bf16 %v343_v15, %v342_v5 }
  0xdb   :  { %179 = vst.msk [vmem:[#allocation2 + $0x8] sm:$0xff] %vm3593_vm3, %v2818_v58  ;;  %v2556_v63 = vcombine.high %v470_v57, %v470_v57  ;;  %v2555_v3 = vcombine.low %v470_v57, %v470_v57  ;;  %v451_v8 = vpop.f32.mrf.mxu0  ;;  %v278_v0 = vadd.f32 %v277_v59, %v3584_v10 }
  0xdc   :  { %v279_v6 = vpop.f32.mrf.mxu1  ;;  %353 = vst.msk [vmem:[#allocation2 + $0x20] sm:$0xff] %vm3593_vm3, %v2821_v56  ;;  %v452_v2 = vadd.f32 %v451_v8, %v3584_v10 }
  0xdd   :  { %2585 = vmatprep.mubr.msk.bf16.mxu0 %vm675_vm4, %v2556_v63  ;;  %v280_v4 = vadd.f32 %v279_v6, %v3587_v11  ;;  %v453_v62 = vpop.f32.mrf.mxu0  ;;  %v284_v5 = vmax.f32 %v278_v0, 0.0  ;;  %v3616_v63 = vld [vmem:[#allocation2 + $0x10] sm:$0xff] }
  0xde   :  { %902 = vmatmul.mubr.bf16.vlgmr.msra.gmra.mxu0 %v2555_v3  ;;  %v281_v1 = vpop.f32.mrf.mxu1  ;;  %v458_v9 = vmax.f32 %v452_v2, 0.0  ;;  %v454_v57 = vadd.f32 %v453_v62, %v3587_v11  ;;  %v3703_v61 = vcombine.low %v3616_v63, %v3616_v63 }
  0xdf   :  { %1000 = vmatpush1.bf16.msra.mxu0 %v3233_v12  ;;  %v285_v7 = vmax.f32 %v280_v4, 0.0  ;;  %v455_v60 = vpop.f32.mrf.mxu0  ;;  %v2974_v1 = vld [vmem:[%s4657_s3 + $0x18] sm:$0xff]  }
  0xe0   :  { %1001 = vmatprep.subr.bf16.mxu0 %v3239_v13  ;;  %v282_v56 = vpop.f32.mrf.mxu1  ;;  %v459_v15 = vmax.f32 %v454_v57, 0.0  ;;  %v2976_v57 = vld [vmem:[%s4657_s3 + $0x8] sm:$0xff]   ;;  %v2978_v60 = vld [vmem:[%s4657_s3 + $0x58] sm:$0xff]  }
  0xe1   :  { %v2820_v58 = vpack.c.bf16 %v285_v7, %v284_v5  ;;  %v456_v17 = vpop.f32.mrf.mxu0  ;;  %v2977_v7 = vld [vmem:[%s4657_s3] sm:$0xff]   ;;  %v2979_v56 = vld [vmem:[%s4657_s3 + $0x50] sm:$0xff]  }
  0xe2   :  { %v499_v59 = vld [vmem:[#allocation2 + $0x8] sm:$0xff]  ;;  %v393_v8 = vpop.f32.mrf.mxu1  ;;  %v2823_v3 = vpack.c.bf16 %v459_v15, %v458_v9  ;;  %v2975_v9 = vld [vmem:[%s4657_s3 + $0x10] sm:$0xff]   ;;  %v2982_v15 = vld [vmem:[%s4657_s3 + $0x98] sm:$0xff]  }
  0xe3   :  { %1002 = vmatpush1.bf16.msra.mxu0 %v3246_v14  ;;  %v2525_v0 = vcombine.high %v499_v59, %v499_v59  ;;  %v3619_v6 = vcombine.low %v499_v59, %v499_v59  ;;  %295 = vst.msk [vmem:[#allocation2 + $0x18] sm:$0xff] %vm3593_vm3, %v2820_v58  ;;  %v394_v12 = vadd.f32 %v393_v8, %v3584_v10  ;;  %v2980_v58 = vld [vmem:[%s4657_s3 + $0x48] sm:$0xff]   ;;  %v2983_v17 = vld [vmem:[%s4657_s3 + $0x90] sm:$0xff]   ;;  %v2981_v59 = vld [vmem:[%s4657_s3 + $0x40] sm:$0xff]  }
  0xe4   :  { %1003 = vmatprep.subr.bf16.mxu0 %v3257_v16  ;;  %v395_v13 = vpop.f32.mrf.mxu1  ;;  %469 = vst.msk [vmem:[#allocation2 + $0x30] sm:$0xff] %vm3593_vm3, %v2823_v3  ;;  %v3631_v14 = vcombine.high %v3616_v63, %v3616_v63  ;;  %v2984_v63 = vld [vmem:[%s4657_s3 + $0x88] sm:$0xff]   ;;  %v2985_v8 = vld [vmem:[%s4657_s3 + $0x80] sm:$0xff]   ;;  %v3762_v3 = vld [vmem:[%s4656_s2 + $0x74] ss:$8 sps:$4 sm:$0xff]  }
  0xe5   :  { %2554 = vmatprep.mubr.msk.bf16.mxu1 %vm675_vm4, %v2525_v0  ;;  %2589 = vmatprep.mubr.msk.bf16.mxu0 %vm675_vm4, %v2525_v0  ;;  %v400_v2 = vmax.f32 %v394_v12, 0.0  ;;  %v396_v4 = vadd.f32 %v395_v13, %v3587_v11  ;;  %v2973_v11 = vld [vmem:[%s4657_s3 + $0x20] sm:$0xff]   ;;  %v2986_v0 = vld [vmem:[%s4657_s3 + $0x78] sm:$0xff]   ;;  %v2988_v12 = vld [vmem:[%s4657_s3 + $0x68] sm:$0xff]  }
  0xe6   :  { %712 = vmatmul.mubr.bf16.vlgmr.msra.gmra.mxu1 %v3619_v6  ;;  %v397_v10 = vpop.f32.mrf.mxu1  ;;  %v2989_v13 = vld [vmem:[%s4657_s3 + $0x60] sm:$0xff]  }
  0xe7   :  { %959 = vmatpush1.bf16.msra.mxu1 %v3267_v18  ;;  %1004 = vmatpush1.bf16.msra.mxu0 %v3272_v19  ;;  %v401_v16 = vmax.f32 %v396_v4, 0.0  ;;  %v4725_v18 = vld [vmem:[#allocation6_spill] sm:$0xff]  ;;  %v4726_v19 = vld [vmem:[#allocation7_spill] sm:$0xff]  ;;  %v2991_v4 = vld [vmem:[%s4657_s3 + $0xb0] sm:$0xff]  }
  0xe8   :  { %960 = vmatprep.subr.bf16.mxu1 %v3277_v20  ;;  %1005 = vmatprep.subr.bf16.mxu0 %v3282_v21  ;;  %v398_v62 = vpop.f32.mrf.mxu1  ;;  %v4727_v20 = vld [vmem:[#allocation8_spill] sm:$0xff]  ;;  %v4728_v21 = vld [vmem:[#allocation9_spill] sm:$0xff]  ;;  %4738 = vst [vmem:[#allocation6_spill] sm:$0xff] %v3762_v3  ;;  %v2992_v10 = vld [vmem:[%s4657_s3 + $0xa8] sm:$0xff]  }
  0xe9   :  { %2588 = vmatprep.mubr.msk.bf16.mxu1 %vm675_vm4, %v3631_v14  ;;  %v2822_v5 = vpack.c.bf16 %v401_v16, %v400_v2  ;;  %v2990_v2 = vld [vmem:[%s4657_s3 + $0xb8] sm:$0xff]   ;;  %v2993_v16 = vld [vmem:[%s4657_s3 + $0xa0] sm:$0xff]  }
  0xea   :  { %v3800_v62 = vld [vmem:[%s4656_s2 + $0x154] ss:$8 sps:$4 sm:$0xff]  }
  0xeb   :  { %961 = vmatpush1.bf16.msra.mxu1 %v3290_v22  ;;  %1006 = vmatpush1.bf16.msra.mxu0 %v3296_v23  ;;  %411 = vst.msk [vmem:[#allocation2 + $0x28] sm:$0xff] %vm3593_vm3, %v2822_v5  ;;  %v4729_v22 = vld [vmem:[#allocation10_spill] sm:$0xff]  ;;  %v4730_v23 = vld [vmem:[#allocation11_spill] sm:$0xff] }
  0xec   :  { %962 = vmatprep.subr.bf16.mxu1 %v3301_v24  ;;  %1007 = vmatprep.subr.bf16.mxu0 %v3307_v25  ;;  %v4731_v24 = vld [vmem:[#allocation12_spill] sm:$0xff]  ;;  %v4732_v25 = vld [vmem:[#allocation13_spill] sm:$0xff] }
  0xef   :  { %963 = vmatpush1.bf16.msra.mxu1 %v3315_v26  ;;  %1008 = vmatpush1.bf16.msra.mxu0 %v3320_v27  ;;  %v2970_v26 = vld [vmem:[%s4657_s3 + $0x38] sm:$0xff]  }
  0xf0   :  { %964 = vmatprep.subr.bf16.mxu1 %v3325_v28  ;;  %1009 = vmatprep.subr.bf16.mxu0 %v3331_v29  ;;  %v4733_v28 = vld [vmem:[#allocation14_spill] sm:$0xff] }
  0xf3   :  { %965 = vmatpush1.bf16.msra.mxu1 %v3339_v30  ;;  %1010 = vmatpush1.bf16.msra.mxu0 %v3344_v31  ;;  %v4734_v30 = vmov 0  }
  0xf4   :  { %966 = vmatprep.subr.bf16.mxu1 %v3349_v32  ;;  %1011 = vmatprep.subr.bf16.mxu0 %v3355_v33  ;;  %v4735_v32 = vld [vmem:[#allocation15_spill] sm:$0xff] }
  0xf7   :  { %967 = vmatpush1.bf16.msra.mxu1 %v3363_v34  ;;  %1012 = vmatpush1.bf16.msra.mxu0 %v3368_v35  ;;  %v2971_v34 = vld [vmem:[%s4657_s3 + $0x30] sm:$0xff]  }
  0xf8   :  { %968 = vmatprep.subr.bf16.mxu1 %v3373_v36  ;;  %1013 = vmatprep.subr.bf16.mxu0 %v3379_v37  ;;  %v4736_v36 = vld [vmem:[#allocation16_spill] sm:$0xff] }
  0xfb   :  { %969 = vmatpush1.bf16.msra.mxu1 %v3387_v38  ;;  %1014 = vmatpush1.bf16.msra.mxu0 %v3392_v39  ;;  %v4737_v38 = vld [vmem:[#allocation17_spill] sm:$0xff] }
  0xfc   :  { %970 = vmatprep.subr.bf16.mxu1 %v3397_v40  ;;  %1019 = vmatprep.subr.bf16.mxu0 %v3403_v41  ;;  %v2972_v40 = vld [vmem:[%s4657_s3 + $0x28] sm:$0xff]  }
  0xff   :  { %971 = vmatpush1.bf16.msra.mxu1 %v3411_v42  ;;  %1020 = vmatpush2.bf16.msra.mxu0 %v3416_v43 }
 0x100   :  { %972 = vmatprep.subr.bf16.mxu1 %v3421_v44  ;;  %1021 = vmatprep.subr.bf16.mxu0 %v3427_v45 }
 0x103   :  { %973 = vmatpush1.bf16.msra.mxu1 %v3439_v46  ;;  %1022 = vmatpush2.bf16.msra.mxu0 %v3444_v47 }
 0x104   :  { %978 = vmatprep.subr.bf16.mxu1 %v3451_v48  ;;  %1023 = vmatprep.subr.bf16.mxu0 %v3456_v49 }
 0x107   :  { %979 = vmatpush2.bf16.msra.mxu1 %v3461_v50  ;;  %1024 = vmatpush2.bf16.msra.mxu0 %v3466_v51 }
 0x108   :  { %980 = vmatprep.subr.bf16.mxu1 %v3475_v52  ;;  %1025 = vmatprep.subr.bf16.mxu0 %v3480_v53 }
 0x10b   :  { %981 = vmatpush2.bf16.msra.mxu1 %v3485_v54  ;;  %1026 = vmatpush2.bf16.msra.mxu0 %v3490_v55 }
 0x10c   :  { %982 = vmatprep.subr.bf16.mxu1 %v4725_v18  ;;  %1027 = vmatprep.subr.bf16.mxu0 %v4726_v19 }
 0x10f   :  { %983 = vmatpush2.bf16.msra.mxu1 %v4727_v20  ;;  %1028 = vmatpush2.bf16.msra.mxu0 %v4728_v21 }
 0x110   :  { %984 = vmatprep.subr.bf16.mxu1 %v4729_v22  ;;  %1029 = vmatprep.subr.bf16.mxu0 %v4730_v23 }
 0x113   :  { %985 = vmatpush2.bf16.msra.mxu1 %v4731_v24  ;;  %1030 = vmatpush2.bf16.msra.mxu0 %v4732_v25 }
 0x114   :  { %986 = vmatprep.subr.bf16.mxu1 %v4733_v28  ;;  %1262 = vmatprep.subr.bf16.mxu0 %v4734_v30 }
 0x116   :  { %1032 = vmatmul.mubr.bf16.vlgmr.msra.gmra.mxu0 %v3619_v6  ;;  %v2987_v6 = vld [vmem:[%s4657_s3 + $0x70] sm:$0xff]  }
 0x117   :  { %987 = vmatpush2.bf16.msra.mxu1 %v4735_v32  ;;  %1263 = vmatpush1.bf16.msra.mxu0 %v2970_v26 }
 0x118   :  { %988 = vmatprep.subr.bf16.mxu1 %v4736_v36  ;;  %1264 = vmatprep.subr.bf16.mxu0 %v4734_v30 }
 0x11b   :  { %989 = vmatpush2.bf16.msra.mxu1 %v4737_v38  ;;  %1265 = vmatpush1.bf16.msra.mxu0 %v2971_v34  ;;  %v4739_v34 = vld [vmem:[#allocation18_spill] sm:$0xff] }
 0x11c   :  { %1266 = vmatprep.subr.bf16.mxu0 %v4734_v30  ;;  %1147 = vmatprep.subr.bf16.mxu1 %v4734_v30 }
 0x11e   :  { %991 = vmatmul.mubr.bf16.vlgmr.msra.gmra.mxu1 %v3703_v61 }
 0x11f   :  { %1267 = vmatpush1.bf16.msra.mxu0 %v2972_v40  ;;  %1148 = vmatpush1.bf16.msra.mxu1 %v2982_v15  ;;  %v912_v40 = vsub.s32 1, %v4739_v34  ;;  %v4339_v34 = vld [vmem:[%s4656_s2 + $0x164] ss:$8 sps:$4 sm:$0xff]  }
 0x120   :  { %1268 = vmatprep.subr.bf16.mxu0 %v4734_v30  ;;  %1149 = vmatprep.subr.bf16.mxu1 %v4734_v30 }
 0x123   :  { %1269 = vmatpush1.bf16.msra.mxu0 %v2973_v11  ;;  %1150 = vmatpush1.bf16.msra.mxu1 %v2983_v17 }
 0x124   :  { %1270 = vmatprep.subr.bf16.mxu0 %v4734_v30  ;;  %1151 = vmatprep.subr.bf16.mxu1 %v4734_v30 }
 0x127   :  { %1271 = vmatpush1.bf16.msra.mxu0 %v2974_v1  ;;  %1152 = vmatpush1.bf16.msra.mxu1 %v2984_v63 }
 0x128   :  { %1272 = vmatprep.subr.bf16.mxu0 %v4734_v30  ;;  %1153 = vmatprep.subr.bf16.mxu1 %v4734_v30 }
 0x12b   :  { %1273 = vmatpush1.bf16.msra.mxu0 %v2975_v9  ;;  %1154 = vmatpush1.bf16.msra.mxu1 %v2985_v8  ;;  %v4740_v9 = vld [vmem:[#allocation19_spill] sm:$0xff] }
 0x12c   :  { %1274 = vmatprep.subr.bf16.mxu0 %v4734_v30  ;;  %1155 = vmatprep.subr.bf16.mxu1 %v4734_v30 }
 0x12f   :  { %1275 = vmatpush1.bf16.msra.mxu0 %v2976_v57  ;;  %1156 = vmatpush1.bf16.msra.mxu1 %v2986_v0  ;;  %v3805_v57 = vrot.slane %v4740_v9, %v912_v40 }
 0x130   :  { %1276 = vmatprep.subr.bf16.mxu0 %v4734_v30  ;;  %1157 = vmatprep.subr.bf16.mxu1 %v4734_v30 }
 0x133   :  { %1277 = vmatpush1.bf16.msra.mxu0 %v2977_v7  ;;  %1158 = vmatpush1.bf16.msra.mxu1 %v2987_v6 }
 0x134   :  { %1286 = vmatprep.subr.bf16.mxu0 %v4734_v30  ;;  %1159 = vmatprep.subr.bf16.mxu1 %v4734_v30 }
 0x137   :  { %1287 = vmatpush2.bf16.msra.mxu0 %v2978_v60  ;;  %1160 = vmatpush1.bf16.msra.mxu1 %v2988_v12 }
 0x138   :  { %1288 = vmatprep.subr.bf16.mxu0 %v4734_v30  ;;  %1161 = vmatprep.subr.bf16.mxu1 %v4734_v30 }
 0x13b   :  { %1289 = vmatpush2.bf16.msra.mxu0 %v2979_v56  ;;  %1162 = vmatpush1.bf16.msra.mxu1 %v2989_v13  ;;  %v4741_v56 = vld [vmem:[#allocation20_spill] sm:$0xff] }
 0x13c   :  { %1290 = vmatprep.subr.bf16.mxu0 %v4734_v30  ;;  %1171 = vmatprep.subr.bf16.mxu1 %v4734_v30  ;;  %v3808_v15 = vrot.slane %v4741_v56, %v912_v40  ;;  %v3854_v40 = vld [vmem:[%s4656_s2 + $0x40] ss:$8 sps:$4 sm:$0xff]   ;;  %4754 = vst [vmem:[#allocation20_spill] sm:$0xff] %v4339_v34 }
 0x13d   :  { %v3920_v56 = vld [vmem:[%s4656_s2 + $0x140] ss:$8 sps:$4 sm:$0xff]  }
 0x13f   :  { %1291 = vmatpush2.bf16.msra.mxu0 %v2980_v58  ;;  %1172 = vmatpush2.bf16.msra.mxu1 %v2990_v2 }
 0x140   :  { %1292 = vmatprep.subr.bf16.mxu0 %v4734_v30  ;;  %1173 = vmatprep.subr.bf16.mxu1 %v4734_v30 }
 0x143   :  { %1293 = vmatpush2.bf16.msra.mxu0 %v2981_v59  ;;  %1174 = vmatpush2.bf16.msra.mxu1 %v2991_v4  ;;  %v3816_v4 = vld [vmem:[%s4656_s2 + $0x70] ss:$8 sps:$4 sm:$0xff]  }
 0x144   :  { %1353 = vmatprep.subr.bf16.mxu0 %v3762_v3  ;;  %1175 = vmatprep.subr.bf16.mxu1 %v4734_v30 }
 0x147   :  { %1176 = vmatpush2.bf16.msra.mxu1 %v2992_v10  ;;  %v3824_v10 = vld [vmem:[%s4656_s2 + $0x64] ss:$8 sps:$4 sm:$0xff]  }
 0x148   :  { %1177 = vmatprep.subr.bf16.mxu1 %v4734_v30 }
 0x14b   :  { %1178 = vmatpush2.bf16.msra.mxu1 %v2993_v16  ;;  %v3830_v16 = vld [vmem:[%s4656_s2 + $0x60] ss:$8 sps:$4 sm:$0xff]  }
 0x14c   :  { %1312 = vmatprep.subr.bf16.mxu1 %v3800_v62 }
 0x19e   :  { %v903_v5 = vpop.f32.mrf.mxu0 }
 0x1a0   :  { %v905_v26 = vpop.f32.mrf.mxu0 }
 0x1a2   :  { %v907_v11 = vpop.f32.mrf.mxu0 }
 0x1a3   :  { %v3860_v11 = vld [vmem:[%s4656_s2 + $0x34] ss:$8 sps:$4 sm:$0xff]  }
 0x1a4   :  { %v908_v1 = vpop.f32.mrf.mxu0 }
 0x1a6   :  { %v713_v7 = vpop.f32.mrf.mxu1 }
 0x1a7   :  { %v904_v60 = vadd.f32 %v903_v5, %v713_v7  ;;  %v3836_v5 = vld [vmem:[%s4656_s2 + $0x54] ss:$8 sps:$4 sm:$0xff]  }
 0x1a8   :  { %v715_v58 = vpop.f32.mrf.mxu1 }
 0x1a9   :  { %v918_v17 = vadd.f32 %v3805_v57, %v904_v60  ;;  %v906_v59 = vadd.f32 %v905_v26, %v715_v58  ;;  %v3848_v26 = vld [vmem:[%s4656_s2 + $0x44] ss:$8 sps:$4 sm:$0xff]   ;;  %v3902_v60 = vld [vmem:[%s4656_s2 + $0x150] ss:$8 sps:$4 sm:$0xff]   ;;  %v3927_v58 = vld [vmem:[%s4656_s2 + $0x134] ss:$8 sps:$4 sm:$0xff]  }
 0x1aa   :  { %v717_v63 = vpop.f32.mrf.mxu1 }
 0x1ab   :  { %v919_v8 = vadd.f32 %v3808_v15, %v906_v59  ;;  %v920_v0 = vmax.f32 %v918_v17, 0.0  ;;  %v3934_v17 = vld [vmem:[%s4656_s2 + $0x130] ss:$8 sps:$4 sm:$0xff]   ;;  %v3941_v59 = vld [vmem:[%s4656_s2 + $0x124] ss:$8 sps:$4 sm:$0xff]  }
 0x1ac   :  { %v718_v6 = vpop.f32.mrf.mxu1  ;;  %v3948_v63 = vld [vmem:[%s4656_s2 + $0x120] ss:$8 sps:$4 sm:$0xff]  }
 0x1ad   :  { %v921_v12 = vmax.f32 %v919_v8, 0.0  ;;  %v922_v2 = vpack.c.bf16 %v920_v0, %v920_v0  ;;  %v3955_v8 = vld [vmem:[%s4656_s2 + $0x114] ss:$8 sps:$4 sm:$0xff]   ;;  %v3962_v0 = vld [vmem:[%s4656_s2 + $0x110] ss:$8 sps:$4 sm:$0xff]  }
 0x1ae   :  { %v3969_v6 = vld [vmem:[%s4656_s2 + $0x104] ss:$8 sps:$4 sm:$0xff]  }
 0x1af   :  { %v923_v13 = vpack.c.bf16 %v921_v12, %v921_v12  ;;  %v3976_v12 = vld [vmem:[%s4656_s2 + $0x100] ss:$8 sps:$4 sm:$0xff]  }
 0x1b1   :  { %2639 = vmatprep.mubr.msk.bf16.mxu0 %vm1143_vm5, %v923_v13  ;;  %v3983_v13 = vld [vmem:[%s4656_s2 + $0xf4] ss:$8 sps:$4 sm:$0xff]  }
 0x1b2   :  { %1295 = vmatmul.mubr.bf16.vlgmr.msra.gmra.mxu0 %v922_v2 }
 0x1b3   :  { %1354 = vmatpush1.bf16.msra.mxu0 %v3816_v4  ;;  %2643 = vmatprep.mubr.msk.bf16.mxu0 %vm675_vm4, %v3631_v14  ;;  %v3842_v14 = vld [vmem:[%s4656_s2 + $0x50] ss:$8 sps:$4 sm:$0xff]  }
 0x1b4   :  { %1355 = vmatprep.subr.bf16.mxu0 %v3824_v10 }
 0x1b7   :  { %1356 = vmatpush1.bf16.msra.mxu0 %v3830_v16 }
 0x1b8   :  { %1357 = vmatprep.subr.bf16.mxu0 %v3836_v5 }
 0x1bb   :  { %1358 = vmatpush1.bf16.msra.mxu0 %v3842_v14 }
 0x1bc   :  { %1359 = vmatprep.subr.bf16.mxu0 %v3848_v26 }
 0x1bf   :  { %1360 = vmatpush1.bf16.msra.mxu0 %v3854_v40 }
 0x1c0   :  { %1361 = vmatprep.subr.bf16.mxu0 %v3860_v11 }
 0x1c3   :  { %1362 = vmatpush1.bf16.msra.mxu0 %v3320_v27 }
 0x1c4   :  { %1363 = vmatprep.subr.bf16.mxu0 %v3331_v29 }
 0x1c7   :  { %1364 = vmatpush1.bf16.msra.mxu0 %v3344_v31 }
 0x1c8   :  { %1365 = vmatprep.subr.bf16.mxu0 %v3355_v33 }
 0x1cb   :  { %1366 = vmatpush1.bf16.msra.mxu0 %v3368_v35 }
 0x1cc   :  { %1367 = vmatprep.subr.bf16.mxu0 %v3379_v37 }
 0x1cf   :  { %1368 = vmatpush1.bf16.msra.mxu0 %v3392_v39 }
 0x1d0   :  { %1373 = vmatprep.subr.bf16.mxu0 %v3403_v41 }
 0x1d3   :  { %1374 = vmatpush2.bf16.msra.mxu0 %v3416_v43 }
 0x1d4   :  { %1375 = vmatprep.subr.bf16.mxu0 %v3427_v45 }
 0x1d6   :  { %v1033_v1 = vpop.f32.mrf.mxu0 }
 0x1d7   :  { %1376 = vmatpush2.bf16.msra.mxu0 %v3444_v47 }
 0x1d8   :  { %v1035_v27 = vpop.f32.mrf.mxu0  ;;  %1377 = vmatprep.subr.bf16.mxu0 %v3456_v49 }
 0x1da   :  { %v1037_v29 = vpop.f32.mrf.mxu0 }
 0x1db   :  { %1378 = vmatpush2.bf16.msra.mxu0 %v3466_v51 }
 0x1dc   :  { %v1038_v31 = vpop.f32.mrf.mxu0  ;;  %1379 = vmatprep.subr.bf16.mxu0 %v3480_v53  ;;  %v3883_v53 = vld [vmem:[#allocation2 + $0x18] sm:$0xff] }
 0x1de   :  { %v992_v33 = vpop.f32.mrf.mxu1 }
 0x1df   :  { %v1034_v35 = vadd.f32 %v1033_v1, %v992_v33  ;;  %1380 = vmatpush2.bf16.msra.mxu0 %v3490_v55  ;;  %v3886_v55 = vld [vmem:[#allocation2 + $0x20] sm:$0xff] }
 0x1e0   :  { %v994_v37 = vpop.f32.mrf.mxu1  ;;  %1381 = vmatprep.subr.bf16.mxu0 %v4726_v19  ;;  %v3897_v7 = vcombine.high %v3886_v55, %v3886_v55 }
 0x1e1   :  { %v1040_v39 = vadd.f32 %v1034_v35, %v3805_v57  ;;  %v1036_v41 = vadd.f32 %v1035_v27, %v994_v37 }
 0x1e2   :  { %v996_v43 = vpop.f32.mrf.mxu1 }
 0x1e3   :  { %v1041_v45 = vadd.f32 %v1036_v41, %v3808_v15  ;;  %1382 = vmatpush2.bf16.msra.mxu0 %v4728_v21  ;;  %v1042_v47 = vmax.f32 %v1040_v39, 0.0  ;;  %v3892_v21 = vcombine.high %v3883_v53, %v3883_v53 }
 0x1e4   :  { %v997_v49 = vpop.f32.mrf.mxu1  ;;  %1383 = vmatprep.subr.bf16.mxu0 %v4730_v23 }
 0x1e5   :  { %v1043_v51 = vmax.f32 %v1041_v45, 0.0  ;;  %v1044_v19 = vpack.c.bf16 %v1042_v47, %v1042_v47 }
 0x1e7   :  { %v1045_v9 = vpack.c.bf16 %v1043_v51, %v1043_v51  ;;  %1384 = vmatpush2.bf16.msra.mxu0 %v4732_v25 }
 0x1e8   :  { %1551 = vmatprep.subr.bf16.mxu0 %v3800_v62 }
 0x1e9   :  { %2626 = vmatprep.mubr.msk.bf16.mxu1 %vm1143_vm5, %v1045_v9 }
 0x1ea   :  { %1180 = vmatmul.mubr.bf16.vlgmr.msra.gmra.mxu1 %v1044_v19  ;;  %1386 = vmatmul.mubr.bf16.vlgmr.msra.gmra.mxu0 %v3703_v61  ;;  %v3913_v61 = vld [vmem:[%s4656_s2 + $0x144] ss:$8 sps:$4 sm:$0xff]  }
 0x1eb   :  { %1313 = vmatpush1.bf16.msra.mxu1 %v3902_v60  ;;  %2642 = vmatprep.mubr.msk.bf16.mxu1 %vm675_vm4, %v3892_v21 }
 0x1ec   :  { %1552 = vmatpush1.bf16.msra.mxu0 %v3902_v60  ;;  %2683 = vmatprep.mubr.msk.bf16.mxu0 %vm675_vm4, %v3897_v7 }
 0x1ed   :  { %1314 = vmatprep.subr.bf16.mxu1 %v3913_v61  ;;  %1553 = vmatprep.subr.bf16.mxu0 %v3913_v61 }
 0x1ef   :  { %1315 = vmatpush1.bf16.msra.mxu1 %v3920_v56 }
 0x1f0   :  { %1554 = vmatpush1.bf16.msra.mxu0 %v3920_v56  ;;  %1316 = vmatprep.subr.bf16.mxu1 %v3927_v58 }
 0x1f1   :  { %1555 = vmatprep.subr.bf16.mxu0 %v3927_v58 }
 0x1f3   :  { %1317 = vmatpush1.bf16.msra.mxu1 %v3934_v17 }
 0x1f4   :  { %1556 = vmatpush1.bf16.msra.mxu0 %v3934_v17  ;;  %1318 = vmatprep.subr.bf16.mxu1 %v3941_v59 }
 0x1f5   :  { %1557 = vmatprep.subr.bf16.mxu0 %v3941_v59 }
 0x1f7   :  { %1319 = vmatpush1.bf16.msra.mxu1 %v3948_v63 }
 0x1f8   :  { %1558 = vmatpush1.bf16.msra.mxu0 %v3948_v63  ;;  %1320 = vmatprep.subr.bf16.mxu1 %v3955_v8 }
 0x1f9   :  { %1559 = vmatprep.subr.bf16.mxu0 %v3955_v8 }
 0x1fb   :  { %1321 = vmatpush1.bf16.msra.mxu1 %v3962_v0 }
 0x1fc   :  { %1560 = vmatpush1.bf16.msra.mxu0 %v3962_v0  ;;  %1322 = vmatprep.subr.bf16.mxu1 %v3969_v6 }
 0x1fd   :  { %1561 = vmatprep.subr.bf16.mxu0 %v3969_v6 }
 0x1ff   :  { %1323 = vmatpush1.bf16.msra.mxu1 %v3976_v12 }
 0x200   :  { %1562 = vmatpush1.bf16.msra.mxu0 %v3976_v12  ;;  %1324 = vmatprep.subr.bf16.mxu1 %v3983_v13 }
 0x201   :  { %1563 = vmatprep.subr.bf16.mxu0 %v3983_v13 }
 0x203   :  { %1325 = vmatpush1.bf16.msra.mxu1 %v3411_v42 }
 0x204   :  { %1564 = vmatpush1.bf16.msra.mxu0 %v3411_v42  ;;  %1326 = vmatprep.subr.bf16.mxu1 %v3421_v44  ;;  %v4019_v42 = vcombine.low %v3883_v53, %v3883_v53 }
 0x205   :  { %1565 = vmatprep.subr.bf16.mxu0 %v3421_v44  ;;  %v4024_v44 = vcombine.low %v3886_v55, %v3886_v55 }
 0x207   :  { %1327 = vmatpush1.bf16.msra.mxu1 %v3439_v46 }
 0x208   :  { %1566 = vmatpush1.bf16.msra.mxu0 %v3439_v46  ;;  %1332 = vmatprep.subr.bf16.mxu1 %v3451_v48  ;;  %v2998_v46 = vld [vmem:[%s4657_s3 + $0xf8] sm:$0xff]  }
 0x209   :  { %1571 = vmatprep.subr.bf16.mxu0 %v3451_v48  ;;  %v2999_v48 = vld [vmem:[%s4657_s3 + $0xf0] sm:$0xff]  }
 0x20b   :  { %1333 = vmatpush2.bf16.msra.mxu1 %v3461_v50 }
 0x20c   :  { %1572 = vmatpush2.bf16.msra.mxu0 %v3461_v50  ;;  %1334 = vmatprep.subr.bf16.mxu1 %v3475_v52  ;;  %v3000_v50 = vld [vmem:[%s4657_s3 + $0xe8] sm:$0xff]  }
 0x20d   :  { %1573 = vmatprep.subr.bf16.mxu0 %v3475_v52  ;;  %v3001_v52 = vld [vmem:[%s4657_s3 + $0xe0] sm:$0xff]  }
 0x20f   :  { %1335 = vmatpush2.bf16.msra.mxu1 %v3485_v54 }
 0x210   :  { %1574 = vmatpush2.bf16.msra.mxu0 %v3485_v54  ;;  %1336 = vmatprep.subr.bf16.mxu1 %v4725_v18  ;;  %v3002_v54 = vld [vmem:[%s4657_s3 + $0xd8] sm:$0xff]  }
 0x211   :  { %1575 = vmatprep.subr.bf16.mxu0 %v4725_v18  ;;  %v3003_v18 = vld [vmem:[%s4657_s3 + $0xd0] sm:$0xff]  }
 0x213   :  { %1337 = vmatpush2.bf16.msra.mxu1 %v4727_v20 }
 0x214   :  { %1576 = vmatpush2.bf16.msra.mxu0 %v4727_v20  ;;  %1338 = vmatprep.subr.bf16.mxu1 %v4729_v22  ;;  %v3004_v20 = vld [vmem:[%s4657_s3 + $0xc8] sm:$0xff]  }
 0x215   :  { %1577 = vmatprep.subr.bf16.mxu0 %v4729_v22  ;;  %v3005_v22 = vld [vmem:[%s4657_s3 + $0xc0] sm:$0xff]  }
 0x217   :  { %1339 = vmatpush2.bf16.msra.mxu1 %v4731_v24 }
 0x218   :  { %1578 = vmatpush2.bf16.msra.mxu0 %v4731_v24  ;;  %1340 = vmatprep.subr.bf16.mxu1 %v4733_v28  ;;  %v3006_v24 = vld [vmem:[%s4657_s3 + $0x118] sm:$0xff]  }
 0x219   :  { %1579 = vmatprep.subr.bf16.mxu0 %v4733_v28  ;;  %v3007_v28 = vld [vmem:[%s4657_s3 + $0x110] sm:$0xff]  }
 0x21b   :  { %1341 = vmatpush2.bf16.msra.mxu1 %v4735_v32 }
 0x21c   :  { %1580 = vmatpush2.bf16.msra.mxu0 %v4735_v32  ;;  %1342 = vmatprep.subr.bf16.mxu1 %v4736_v36  ;;  %v3008_v32 = vld [vmem:[%s4657_s3 + $0x108] sm:$0xff]  }
 0x21d   :  { %1581 = vmatprep.subr.bf16.mxu0 %v4736_v36  ;;  %v3009_v36 = vld [vmem:[%s4657_s3 + $0x100] sm:$0xff]  }
 0x21f   :  { %1343 = vmatpush2.bf16.msra.mxu1 %v4737_v38 }
 0x220   :  { %1582 = vmatpush2.bf16.msra.mxu0 %v4737_v38  ;;  %1500 = vmatprep.subr.bf16.mxu1 %v4734_v30 }
 0x221   :  { %1739 = vmatprep.subr.bf16.mxu0 %v4734_v30 }
 0x222   :  { %1345 = vmatmul.mubr.bf16.vlgmr.msra.gmra.mxu1 %v4019_v42 }
 0x223   :  { %1584 = vmatmul.mubr.bf16.vlgmr.msra.gmra.mxu0 %v4024_v44  ;;  %1501 = vmatpush1.bf16.msra.mxu1 %v2998_v46 }
 0x224   :  { %1502 = vmatprep.subr.bf16.mxu1 %v4734_v30 }
 0x227   :  { %1503 = vmatpush1.bf16.msra.mxu1 %v2999_v48 }
 0x228   :  { %1504 = vmatprep.subr.bf16.mxu1 %v4734_v30 }
 0x22b   :  { %1505 = vmatpush1.bf16.msra.mxu1 %v3000_v50 }
 0x22c   :  { %1506 = vmatprep.subr.bf16.mxu1 %v4734_v30 }
 0x22f   :  { %1507 = vmatpush1.bf16.msra.mxu1 %v3001_v52 }
 0x230   :  { %1508 = vmatprep.subr.bf16.mxu1 %v4734_v30 }
 0x233   :  { %1509 = vmatpush1.bf16.msra.mxu1 %v3002_v54 }
 0x234   :  { %1510 = vmatprep.subr.bf16.mxu1 %v4734_v30 }
 0x237   :  { %1511 = vmatpush1.bf16.msra.mxu1 %v3003_v18 }
 0x238   :  { %1512 = vmatprep.subr.bf16.mxu1 %v4734_v30 }
 0x23b   :  { %1513 = vmatpush1.bf16.msra.mxu1 %v3004_v20 }
 0x23c   :  { %1514 = vmatprep.subr.bf16.mxu1 %v4734_v30 }
 0x23f   :  { %1515 = vmatpush1.bf16.msra.mxu1 %v3005_v22 }
 0x240   :  { %1524 = vmatprep.subr.bf16.mxu1 %v4734_v30 }
 0x243   :  { %1525 = vmatpush2.bf16.msra.mxu1 %v3006_v24 }
 0x244   :  { %1526 = vmatprep.subr.bf16.mxu1 %v4734_v30 }
 0x247   :  { %1527 = vmatpush2.bf16.msra.mxu1 %v3007_v28  ;;  %v4099_v28 = vld [vmem:[%s4656_s2 + $0x30] ss:$8 sps:$4 sm:$0xff]  }
 0x248   :  { %1528 = vmatprep.subr.bf16.mxu1 %v4734_v30 }
 0x24b   :  { %1529 = vmatpush2.bf16.msra.mxu1 %v3008_v32  ;;  %v4111_v32 = vld [vmem:[%s4656_s2 + $0x20] ss:$8 sps:$4 sm:$0xff]  }
 0x24c   :  { %1530 = vmatprep.subr.bf16.mxu1 %v4734_v30 }
 0x24f   :  { %1531 = vmatpush2.bf16.msra.mxu1 %v3009_v36  ;;  %v4117_v36 = vld [vmem:[%s4656_s2 + $0x14] ss:$8 sps:$4 sm:$0xff]  }
 0x250   :  { %1592 = vmatprep.subr.bf16.mxu1 %v3762_v3 }
 0x272   :  { %v1296_v38 = vpop.f32.mrf.mxu0 }
 0x274   :  { %v1298_v2 = vpop.f32.mrf.mxu0 }
 0x275   :  { %v4129_v2 = vld [vmem:[%s4656_s2 + $0x4] ss:$8 sps:$4 sm:$0xff]  }
 0x276   :  { %v1299_v1 = vpop.f32.mrf.mxu0 }
 0x277   :  { %v4135_v1 = vld [vmem:[%s4656_s2] ss:$8 sps:$4 sm:$0xff]  }
 0x278   :  { %v1300_v27 = vpop.f32.mrf.mxu0 }
 0x279   :  { %v4141_v27 = vld [vmem:[%s4656_s2 + $0xd4] ss:$8 sps:$4 sm:$0xff]  }
 0x2aa   :  { %v1181_v29 = vpop.f32.mrf.mxu1  ;;  %v1387_v31 = vpop.f32.mrf.mxu0 }
 0x2ab   :  { %v4077_v33 = vadd.f32 %v1296_v38, %v1181_v29  ;;  %v4123_v38 = vld [vmem:[%s4656_s2 + $0x10] ss:$8 sps:$4 sm:$0xff]  }
 0x2ac   :  { %v1183_v35 = vpop.f32.mrf.mxu1  ;;  %v1389_v37 = vpop.f32.mrf.mxu0  ;;  %v4147_v29 = vld [vmem:[%s4656_s2 + $0xd0] ss:$8 sps:$4 sm:$0xff]  }
 0x2ad   :  { %v4159_v35 = vld [vmem:[%s4656_s2 + $0xc0] ss:$8 sps:$4 sm:$0xff]  }
 0x2ae   :  { %v1184_v39 = vpop.f32.mrf.mxu1  ;;  %v1391_v41 = vpop.f32.mrf.mxu0 }
 0x2af   :  { %v4171_v39 = vld [vmem:[%s4656_s2 + $0xb0] ss:$8 sps:$4 sm:$0xff]   ;;  %v4177_v41 = vld [vmem:[%s4656_s2 + $0xa4] ss:$8 sps:$4 sm:$0xff]  }
 0x2b0   :  { %v1185_v43 = vpop.f32.mrf.mxu1  ;;  %v1392_v45 = vpop.f32.mrf.mxu0 }
 0x2b1   :  { %v4183_v43 = vld [vmem:[%s4656_s2 + $0xa0] ss:$8 sps:$4 sm:$0xff]   ;;  %v4189_v45 = vld [vmem:[%s4656_s2 + $0x94] ss:$8 sps:$4 sm:$0xff]  }
 0x2e2   :  { %v1346_v47 = vpop.f32.mrf.mxu1 }
 0x2e3   :  { %v1388_v49 = vadd.f32 %v1387_v31, %v1346_v47  ;;  %v4079_v51 = vpop.f32.mrf.mxu0  ;;  %v4153_v31 = vld [vmem:[%s4656_s2 + $0xc4] ss:$8 sps:$4 sm:$0xff]   ;;  %v4195_v47 = vld [vmem:[%s4656_s2 + $0x90] ss:$8 sps:$4 sm:$0xff]  }
 0x2e4   :  { %v1348_v53 = vpop.f32.mrf.mxu1 }
 0x2e5   :  { %v1394_v9 = vadd.f32 %v1388_v49, %v3805_v57  ;;  %v1390_v55 = vadd.f32 %v1389_v37, %v1348_v53  ;;  %v4082_v19 = vpop.f32.mrf.mxu0  ;;  %v4165_v37 = vld [vmem:[%s4656_s2 + $0xb4] ss:$8 sps:$4 sm:$0xff]   ;;  %v4199_v49 = vld [vmem:[#allocation2 + $0x28] sm:$0xff] }
 0x2e6   :  { %v1350_v46 = vpop.f32.mrf.mxu1  ;;  %v4205_v53 = vcombine.high %v4199_v49, %v4199_v49 }
 0x2e7   :  { %v1395_v48 = vadd.f32 %v1390_v55, %v3808_v15  ;;  %v1589_v50 = vpop.f32.mrf.mxu0  ;;  %v1396_v52 = vmax.f32 %v1394_v9, 0.0  ;;  %v3015_v9 = vld [vmem:[%s4657_s3 + $0x140] sm:$0xff]   ;;  %v4239_v55 = vld [vmem:[%s4656_s2 + $0xf0] ss:$8 sps:$4 sm:$0xff]  }
 0x2e8   :  { %v1351_v54 = vpop.f32.mrf.mxu1  ;;  %4742 = vst [vmem:[#allocation7_spill] sm:$0xff] %v4205_v53  ;;  %v4246_v46 = vld [vmem:[%s4656_s2 + $0xe4] ss:$8 sps:$4 sm:$0xff]   ;;  %v4255_v50 = vld [vmem:[%s4656_s2 + $0xe0] ss:$8 sps:$4 sm:$0xff]  }
 0x2e9   :  { %v1397_v18 = vmax.f32 %v1395_v48, 0.0  ;;  %v1590_v20 = vpop.f32.mrf.mxu0  ;;  %v1398_v24 = vpack.c.bf16 %v1396_v52, %v1396_v52  ;;  %v3016_v48 = vld [vmem:[%s4657_s3 + $0x138] sm:$0xff]   ;;  %4743 = vst [vmem:[#allocation8_spill] sm:$0xff] %v4255_v50  ;;  %v3017_v54 = vld [vmem:[%s4657_s3 + $0x130] sm:$0xff]  }
 0x2ea   :  { %v4262_v52 = vld [vmem:[%s4656_s2 + $0x1b4] ss:$8 sps:$4 sm:$0xff]   ;;  %v4278_v20 = vld [vmem:[%s4656_s2 + $0x1a4] ss:$8 sps:$4 sm:$0xff]  }
 0x2eb   :  { %v1399_v22 = vpack.c.bf16 %v1397_v18, %v1397_v18  ;;  %4744 = vst [vmem:[#allocation9_spill] sm:$0xff] %v4262_v52  ;;  %v4271_v18 = vld [vmem:[%s4656_s2 + $0x1b0] ss:$8 sps:$4 sm:$0xff]   ;;  %4746 = vst [vmem:[#allocation11_spill] sm:$0xff] %v4278_v20 }
 0x2ec   :  { %4745 = vst [vmem:[#allocation10_spill] sm:$0xff] %v4271_v18 }
 0x2ed   :  { %2680 = vmatprep.mubr.msk.bf16.mxu1 %vm1143_vm5, %v1399_v22  ;;  %v3018_v22 = vld [vmem:[%s4657_s3 + $0x128] sm:$0xff]  }
 0x2ee   :  { %1533 = vmatmul.mubr.bf16.vlgmr.msra.gmra.mxu1 %v1398_v24  ;;  %v4287_v24 = vld [vmem:[%s4656_s2 + $0x1a0] ss:$8 sps:$4 sm:$0xff]  }
 0x2ef   :  { %1593 = vmatpush1.bf16.msra.mxu1 %v3816_v4  ;;  %2684 = vmatprep.mubr.msk.bf16.mxu1 %vm675_vm4, %v3892_v21  ;;  %v4105_v21 = vld [vmem:[%s4656_s2 + $0x24] ss:$8 sps:$4 sm:$0xff]   ;;  %4747 = vst [vmem:[#allocation12_spill] sm:$0xff] %v4287_v24 }
 0x2f0   :  { %1594 = vmatprep.subr.bf16.mxu1 %v3824_v10 }
 0x2f3   :  { %1595 = vmatpush1.bf16.msra.mxu1 %v3830_v16 }
 0x2f4   :  { %1596 = vmatprep.subr.bf16.mxu1 %v3836_v5 }
 0x2f7   :  { %1597 = vmatpush1.bf16.msra.mxu1 %v3842_v14 }
 0x2f8   :  { %1598 = vmatprep.subr.bf16.mxu1 %v3848_v26 }
 0x2fb   :  { %1599 = vmatpush1.bf16.msra.mxu1 %v3854_v40 }
 0x2fc   :  { %1600 = vmatprep.subr.bf16.mxu1 %v3860_v11 }
 0x2ff   :  { %1601 = vmatpush1.bf16.msra.mxu1 %v4099_v28 }
 0x300   :  { %1602 = vmatprep.subr.bf16.mxu1 %v4105_v21 }
 0x303   :  { %1603 = vmatpush1.bf16.msra.mxu1 %v4111_v32 }
 0x304   :  { %1604 = vmatprep.subr.bf16.mxu1 %v4117_v36 }
 0x307   :  { %1605 = vmatpush1.bf16.msra.mxu1 %v4123_v38 }
 0x308   :  { %1606 = vmatprep.subr.bf16.mxu1 %v4129_v2 }
 0x30b   :  { %1607 = vmatpush1.bf16.msra.mxu1 %v4135_v1 }
 0x30c   :  { %1612 = vmatprep.subr.bf16.mxu1 %v4141_v27 }
 0x30f   :  { %1613 = vmatpush2.bf16.msra.mxu1 %v4147_v29 }
 0x310   :  { %1614 = vmatprep.subr.bf16.mxu1 %v4153_v31 }
 0x313   :  { %1615 = vmatpush2.bf16.msra.mxu1 %v4159_v35 }
 0x314   :  { %1616 = vmatprep.subr.bf16.mxu1 %v4165_v37 }
 0x317   :  { %1617 = vmatpush2.bf16.msra.mxu1 %v4171_v39 }
 0x318   :  { %1618 = vmatprep.subr.bf16.mxu1 %v4177_v41 }
 0x31b   :  { %1619 = vmatpush2.bf16.msra.mxu1 %v4183_v43 }
 0x31c   :  { %1620 = vmatprep.subr.bf16.mxu1 %v4189_v45 }
 0x31f   :  { %1621 = vmatpush2.bf16.msra.mxu1 %v4195_v47 }
 0x320   :  { %1622 = vmatprep.subr.bf16.mxu1 %v4730_v23  ;;  %v3012_v23 = vld [vmem:[%s4657_s3 + $0x158] sm:$0xff]  }
 0x321   :  { %1740 = vmatpush1.bf16.msra.mxu0 %v3012_v23  ;;  %v4294_v23 = vld [vmem:[%s4656_s2 + $0x194] ss:$8 sps:$4 sm:$0xff]  }
 0x322   :  { %1741 = vmatprep.subr.bf16.mxu0 %v4734_v30  ;;  %4748 = vst [vmem:[#allocation13_spill] sm:$0xff] %v4294_v23 }
 0x323   :  { %1623 = vmatpush2.bf16.msra.mxu1 %v4732_v25  ;;  %v3013_v25 = vld [vmem:[%s4657_s3 + $0x150] sm:$0xff]  }
 0x324   :  { %1790 = vmatprep.subr.bf16.mxu1 %v3800_v62 }
 0x325   :  { %1742 = vmatpush1.bf16.msra.mxu0 %v3013_v25  ;;  %v3019_v25 = vld [vmem:[%s4657_s3 + $0x120] sm:$0xff]  }
 0x326   :  { %1625 = vmatmul.mubr.bf16.vlgmr.msra.gmra.mxu1 %v4019_v42  ;;  %v3014_v42 = vld [vmem:[%s4657_s3 + $0x148] sm:$0xff]   ;;  %1743 = vmatprep.subr.bf16.mxu0 %v4734_v30 }
 0x327   :  { %1791 = vmatpush1.bf16.msra.mxu1 %v3902_v60  ;;  %2724 = vmatprep.mubr.msk.bf16.mxu1 %vm675_vm4, %v4205_v53  ;;  %v4350_v53 = vcombine.low %v4199_v49, %v4199_v49  ;;  %v3023_v49 = vld [vmem:[%s4657_s3 + $0x160] sm:$0xff]  }
 0x328   :  { %1792 = vmatprep.subr.bf16.mxu1 %v3913_v61 }
 0x329   :  { %1744 = vmatpush1.bf16.msra.mxu0 %v3014_v42  ;;  %v4303_v42 = vld [vmem:[%s4656_s2 + $0x190] ss:$8 sps:$4 sm:$0xff]   ;;  %4756 = vst [vmem:[#allocation22_spill] sm:$0xff] %v4350_v53 }
 0x32a   :  { %1745 = vmatprep.subr.bf16.mxu0 %v4734_v30  ;;  %4749 = vst [vmem:[#allocation14_spill] sm:$0xff] %v4303_v42 }
 0x32b   :  { %1793 = vmatpush1.bf16.msra.mxu1 %v3920_v56 }
 0x32c   :  { %1794 = vmatprep.subr.bf16.mxu1 %v3927_v58 }
 0x32d   :  { %1746 = vmatpush1.bf16.msra.mxu0 %v3015_v9  ;;  %v4310_v9 = vld [vmem:[%s4656_s2 + $0x184] ss:$8 sps:$4 sm:$0xff]  }
 0x32e   :  { %1747 = vmatprep.subr.bf16.mxu0 %v4734_v30  ;;  %4750 = vst [vmem:[#allocation15_spill] sm:$0xff] %v4310_v9 }
 0x32f   :  { %1795 = vmatpush1.bf16.msra.mxu1 %v3934_v17 }
 0x330   :  { %1796 = vmatprep.subr.bf16.mxu1 %v3941_v59 }
 0x331   :  { %1748 = vmatpush1.bf16.msra.mxu0 %v3016_v48  ;;  %v3020_v48 = vld [vmem:[%s4657_s3 + $0x178] sm:$0xff]  }
 0x332   :  { %1749 = vmatprep.subr.bf16.mxu0 %v4734_v30 }
 0x333   :  { %1797 = vmatpush1.bf16.msra.mxu1 %v3948_v63 }
 0x334   :  { %1798 = vmatprep.subr.bf16.mxu1 %v3955_v8 }
 0x335   :  { %1750 = vmatpush1.bf16.msra.mxu0 %v3017_v54  ;;  %v4319_v54 = vld [vmem:[%s4656_s2 + $0x180] ss:$8 sps:$4 sm:$0xff]  }
 0x336   :  { %1751 = vmatprep.subr.bf16.mxu0 %v4734_v30  ;;  %4751 = vst [vmem:[#allocation16_spill] sm:$0xff] %v4319_v54 }
 0x337   :  { %1799 = vmatpush1.bf16.msra.mxu1 %v3962_v0 }
 0x338   :  { %1800 = vmatprep.subr.bf16.mxu1 %v3969_v6 }
 0x339   :  { %1752 = vmatpush1.bf16.msra.mxu0 %v3018_v22  ;;  %v4326_v22 = vld [vmem:[%s4656_s2 + $0x174] ss:$8 sps:$4 sm:$0xff]  }
 0x33a   :  { %1753 = vmatprep.subr.bf16.mxu0 %v4734_v30  ;;  %4752 = vst [vmem:[#allocation17_spill] sm:$0xff] %v4326_v22 }
 0x33b   :  { %1801 = vmatpush1.bf16.msra.mxu1 %v3976_v12 }
 0x33c   :  { %1802 = vmatprep.subr.bf16.mxu1 %v3983_v13 }
 0x33d   :  { %1754 = vmatpush1.bf16.msra.mxu0 %v3019_v25  ;;  %v4332_v25 = vld [vmem:[%s4656_s2 + $0x170] ss:$8 sps:$4 sm:$0xff]  }
 0x33e   :  { %1763 = vmatprep.subr.bf16.mxu0 %v4734_v30  ;;  %4753 = vst [vmem:[#allocation19_spill] sm:$0xff] %v4332_v25 }
 0x33f   :  { %1803 = vmatpush1.bf16.msra.mxu1 %v4239_v55 }
 0x340   :  { %1804 = vmatprep.subr.bf16.mxu1 %v4246_v46 }
 0x341   :  { %1764 = vmatpush2.bf16.msra.mxu0 %v3020_v48  ;;  %v4345_v48 = vld [vmem:[%s4656_s2 + $0x160] ss:$8 sps:$4 sm:$0xff]  }
 0x342   :  { %1765 = vmatprep.subr.bf16.mxu0 %v4734_v30  ;;  %4755 = vst [vmem:[#allocation21_spill] sm:$0xff] %v4345_v48 }
 0x343   :  { %1805 = vmatpush1.bf16.msra.mxu1 %v4255_v50 }
 0x344   :  { %1810 = vmatprep.subr.bf16.mxu1 %v4262_v52 }
 0x347   :  { %1811 = vmatpush2.bf16.msra.mxu1 %v4271_v18 }
 0x348   :  { %1812 = vmatprep.subr.bf16.mxu1 %v4278_v20 }
 0x34b   :  { %1813 = vmatpush2.bf16.msra.mxu1 %v4287_v24 }
 0x34c   :  { %1814 = vmatprep.subr.bf16.mxu1 %v4294_v23 }
 0x34f   :  { %1815 = vmatpush2.bf16.msra.mxu1 %v4303_v42 }
 0x350   :  { %1816 = vmatprep.subr.bf16.mxu1 %v4310_v9 }
 0x353   :  { %1817 = vmatpush2.bf16.msra.mxu1 %v4319_v54 }
 0x354   :  { %1818 = vmatprep.subr.bf16.mxu1 %v4326_v22 }
 0x357   :  { %1819 = vmatpush2.bf16.msra.mxu1 %v4332_v25  ;;  %v3021_v25 = vld [vmem:[%s4657_s3 + $0x170] sm:$0xff]  }
 0x358   :  { %1820 = vmatprep.subr.bf16.mxu1 %v4339_v34  ;;  %1766 = vmatpush2.bf16.msra.mxu0 %v3021_v25  ;;  %v3022_v34 = vld [vmem:[%s4657_s3 + $0x168] sm:$0xff]  }
 0x359   :  { %1767 = vmatprep.subr.bf16.mxu0 %v4734_v30 }
 0x35b   :  { %1821 = vmatpush2.bf16.msra.mxu1 %v4345_v48 }
 0x35c   :  { %1978 = vmatprep.subr.bf16.mxu1 %v4734_v30  ;;  %1768 = vmatpush2.bf16.msra.mxu0 %v3022_v34 }
 0x35d   :  { %1769 = vmatprep.subr.bf16.mxu0 %v4734_v30 }
 0x35e   :  { %1823 = vmatmul.mubr.bf16.vlgmr.msra.gmra.mxu1 %v4350_v53 }
 0x360   :  { %1770 = vmatpush2.bf16.msra.mxu0 %v3023_v49 }
 0x361   :  { %1831 = vmatprep.subr.bf16.mxu0 %v3762_v3 }
 0x3ae   :  { %v1534_v53 = vpop.f32.mrf.mxu1 }
 0x3af   :  { %v4367_v48 = vadd.f32 %v1534_v53, %v4077_v33  ;;  %v4408_v53 = vld [vmem:[%s4656_s2 + $0x84] ss:$8 sps:$4 sm:$0xff]  }
 0x3b0   :  { %v1536_v25 = vpop.f32.mrf.mxu1 }
 0x3b1   :  { %v3035_v25 = vld [vmem:[%s4657_s3 + $0x1d0] sm:$0xff]  }
 0x3b2   :  { %v1537_v22 = vpop.f32.mrf.mxu1 }
 0x3b4   :  { %v1538_v54 = vpop.f32.mrf.mxu1 }
 0x3b5   :  { %v4769_v54 = vld [vmem:[#allocation21_spill] sm:$0xff] }
 0x3e6   :  { %v1626_v9 = vpop.f32.mrf.mxu1 }
 0x3e7   :  { %v1627_v42 = vadd.f32 %v1626_v9, %v4079_v51  ;;  %v4768_v9 = vld [vmem:[#allocation20_spill] sm:$0xff] }
 0x3e8   :  { %v1628_v34 = vpop.f32.mrf.mxu1 }
 0x3e9   :  { %v1633_v23 = vadd.f32 %v1627_v42, %v3805_v57  ;;  %v1629_v24 = vadd.f32 %v1628_v34, %v4082_v19  ;;  %v4767_v42 = vld [vmem:[#allocation19_spill] sm:$0xff] }
 0x3ea   :  { %v1630_v20 = vpop.f32.mrf.mxu1  ;;  %v3036_v34 = vld [vmem:[%s4657_s3 + $0x1c8] sm:$0xff]  }
 0x3eb   :  { %v1634_v49 = vadd.f32 %v1629_v24, %v3808_v15  ;;  %v1635_v18 = vmax.f32 %v1633_v23, 0.0  ;;  %v3034_v20 = vld [vmem:[%s4657_s3 + $0x1d8] sm:$0xff]   ;;  %v4765_v24 = vld [vmem:[#allocation16_spill] sm:$0xff] }
 0x3ec   :  { %v1631_v3 = vpop.f32.mrf.mxu1  ;;  %v4766_v23 = vld [vmem:[#allocation17_spill] sm:$0xff] }
 0x3ed   :  { %v1636_v52 = vmax.f32 %v1634_v49, 0.0  ;;  %v1637_v33 = vpack.c.bf16 %v1635_v18, %v1635_v18  ;;  %v3037_v49 = vld [vmem:[%s4657_s3 + $0x1c0] sm:$0xff]  }
 0x3ef   :  { %v1638_v50 = vpack.c.bf16 %v1636_v52, %v1636_v52  ;;  %v4416_v52 = vld [vmem:[%s4656_s2 + $0x80] ss:$8 sps:$4 sm:$0xff]  }
 0x3f1   :  { %2721 = vmatprep.mubr.msk.bf16.mxu0 %vm1143_vm5, %v1638_v50  ;;  %v4411_v50 = vld [vmem:[#allocation2 + $0x30] sm:$0xff] }
 0x3f2   :  { %1772 = vmatmul.mubr.bf16.vlgmr.msra.gmra.mxu0 %v1637_v33  ;;  %v2764_v18 = vcombine.high %v4411_v50, %v4411_v50  ;;  %v2763_v22 = vcombine.low %v4411_v50, %v4411_v50  ;;  %v4770_v33 = vld [vmem:[#allocation6_spill] sm:$0xff] }
 0x3f3   :  { %1832 = vmatpush1.bf16.msra.mxu0 %v3816_v4  ;;  %2725 = vmatprep.mubr.msk.bf16.mxu0 %vm675_vm4, %v3897_v7 }
 0x3f4   :  { %1833 = vmatprep.subr.bf16.mxu0 %v3824_v10 }
 0x3f7   :  { %1834 = vmatpush1.bf16.msra.mxu0 %v3830_v16 }
 0x3f8   :  { %1835 = vmatprep.subr.bf16.mxu0 %v3836_v5 }
 0x3fb   :  { %1836 = vmatpush1.bf16.msra.mxu0 %v3842_v14 }
 0x3fc   :  { %1837 = vmatprep.subr.bf16.mxu0 %v3848_v26 }
 0x3ff   :  { %1838 = vmatpush1.bf16.msra.mxu0 %v3854_v40 }
 0x400   :  { %1839 = vmatprep.subr.bf16.mxu0 %v3860_v11 }
 0x403   :  { %1840 = vmatpush1.bf16.msra.mxu0 %v4099_v28 }
 0x404   :  { %1841 = vmatprep.subr.bf16.mxu0 %v4105_v21 }
 0x407   :  { %1842 = vmatpush1.bf16.msra.mxu0 %v4111_v32 }
 0x408   :  { %1843 = vmatprep.subr.bf16.mxu0 %v4117_v36 }
 0x40b   :  { %1844 = vmatpush1.bf16.msra.mxu0 %v4123_v38 }
 0x40c   :  { %1845 = vmatprep.subr.bf16.mxu0 %v4129_v2 }
 0x40f   :  { %1846 = vmatpush1.bf16.msra.mxu0 %v4135_v1 }
 0x410   :  { %1851 = vmatprep.subr.bf16.mxu0 %v4141_v27 }
 0x413   :  { %1852 = vmatpush2.bf16.msra.mxu0 %v4147_v29 }
 0x414   :  { %1853 = vmatprep.subr.bf16.mxu0 %v4153_v31 }
 0x417   :  { %1854 = vmatpush2.bf16.msra.mxu0 %v4159_v35 }
 0x418   :  { %1855 = vmatprep.subr.bf16.mxu0 %v4165_v37 }
 0x41b   :  { %1856 = vmatpush2.bf16.msra.mxu0 %v4171_v39 }
 0x41c   :  { %1857 = vmatprep.subr.bf16.mxu0 %v4177_v41 }
 0x41e   :  { %v4398_v3 = vpop.f32.mrf.mxu1 }
 0x41f   :  { %1858 = vmatpush2.bf16.msra.mxu0 %v4183_v43 }
 0x420   :  { %v4401_v7 = vpop.f32.mrf.mxu1  ;;  %1859 = vmatprep.subr.bf16.mxu0 %v4189_v45 }
 0x422   :  { %v1828_v51 = vpop.f32.mrf.mxu1 }
 0x423   :  { %1860 = vmatpush2.bf16.msra.mxu0 %v4195_v47 }
 0x424   :  { %v1829_v19 = vpop.f32.mrf.mxu1  ;;  %1861 = vmatprep.subr.bf16.mxu0 %v4408_v53 }
 0x427   :  { %1862 = vmatpush2.bf16.msra.mxu0 %v4416_v52 }
 0x428   :  { %2029 = vmatprep.subr.bf16.mxu0 %v3800_v62  ;;  %v3026_v62 = vld [vmem:[%s4657_s3 + $0x1b8] sm:$0xff]  }
 0x429   :  { %1979 = vmatpush1.bf16.msra.mxu1 %v3026_v62 }
 0x42a   :  { %1864 = vmatmul.mubr.bf16.vlgmr.msra.gmra.mxu0 %v4024_v44  ;;  %1980 = vmatprep.subr.bf16.mxu1 %v4734_v30  ;;  %v3033_v44 = vld [vmem:[%s4657_s3 + $0x180] sm:$0xff]  }
 0x42b   :  { %2030 = vmatpush1.bf16.msra.mxu0 %v3902_v60  ;;  %2765 = vmatprep.mubr.msk.bf16.mxu0 %vm675_vm4, %v2764_v18  ;;  %v3027_v60 = vld [vmem:[%s4657_s3 + $0x1b0] sm:$0xff]  }
 0x42c   :  { %2031 = vmatprep.subr.bf16.mxu0 %v3913_v61  ;;  %v3028_v61 = vld [vmem:[%s4657_s3 + $0x1a8] sm:$0xff]  }
 0x42d   :  { %1981 = vmatpush1.bf16.msra.mxu1 %v3027_v60 }
 0x42e   :  { %1982 = vmatprep.subr.bf16.mxu1 %v4734_v30 }
 0x42f   :  { %2032 = vmatpush1.bf16.msra.mxu0 %v3920_v56  ;;  %v3029_v56 = vld [vmem:[%s4657_s3 + $0x1a0] sm:$0xff]  }
 0x430   :  { %2033 = vmatprep.subr.bf16.mxu0 %v3927_v58  ;;  %v3030_v58 = vld [vmem:[%s4657_s3 + $0x198] sm:$0xff]  }
 0x431   :  { %1983 = vmatpush1.bf16.msra.mxu1 %v3028_v61 }
 0x432   :  { %1984 = vmatprep.subr.bf16.mxu1 %v4734_v30 }
 0x433   :  { %2034 = vmatpush1.bf16.msra.mxu0 %v3934_v17  ;;  %v4757_v17 = vld [vmem:[#allocation8_spill] sm:$0xff] }
 0x434   :  { %2035 = vmatprep.subr.bf16.mxu0 %v3941_v59  ;;  %v4758_v59 = vld [vmem:[#allocation9_spill] sm:$0xff] }
 0x435   :  { %1985 = vmatpush1.bf16.msra.mxu1 %v3029_v56 }
 0x436   :  { %1986 = vmatprep.subr.bf16.mxu1 %v4734_v30 }
 0x437   :  { %2036 = vmatpush1.bf16.msra.mxu0 %v3948_v63  ;;  %v3031_v63 = vld [vmem:[%s4657_s3 + $0x190] sm:$0xff]  }
 0x438   :  { %2037 = vmatprep.subr.bf16.mxu0 %v3955_v8  ;;  %v4759_v8 = vld [vmem:[#allocation10_spill] sm:$0xff] }
 0x439   :  { %1987 = vmatpush1.bf16.msra.mxu1 %v3030_v58 }
 0x43a   :  { %1988 = vmatprep.subr.bf16.mxu1 %v4734_v30 }
 0x43b   :  { %2038 = vmatpush1.bf16.msra.mxu0 %v3962_v0  ;;  %v4760_v0 = vld [vmem:[#allocation11_spill] sm:$0xff] }
 0x43c   :  { %2039 = vmatprep.subr.bf16.mxu0 %v3969_v6  ;;  %v3032_v6 = vld [vmem:[%s4657_s3 + $0x188] sm:$0xff]  }
 0x43d   :  { %1989 = vmatpush1.bf16.msra.mxu1 %v3031_v63 }
 0x43e   :  { %1990 = vmatprep.subr.bf16.mxu1 %v4734_v30 }
 0x43f   :  { %2040 = vmatpush1.bf16.msra.mxu0 %v3976_v12  ;;  %v4761_v12 = vld [vmem:[#allocation12_spill] sm:$0xff] }
 0x440   :  { %2041 = vmatprep.subr.bf16.mxu0 %v3983_v13  ;;  %v4762_v13 = vld [vmem:[#allocation13_spill] sm:$0xff] }
 0x441   :  { %1991 = vmatpush1.bf16.msra.mxu1 %v3032_v6 }
 0x442   :  { %1992 = vmatprep.subr.bf16.mxu1 %v4734_v30 }
 0x443   :  { %2042 = vmatpush1.bf16.msra.mxu0 %v4239_v55  ;;  %v4763_v55 = vld [vmem:[#allocation14_spill] sm:$0xff] }
 0x444   :  { %2043 = vmatprep.subr.bf16.mxu0 %v4246_v46  ;;  %v4764_v46 = vld [vmem:[#allocation15_spill] sm:$0xff] }
 0x445   :  { %1993 = vmatpush1.bf16.msra.mxu1 %v3033_v44 }
 0x446   :  { %2002 = vmatprep.subr.bf16.mxu1 %v4734_v30 }
 0x447   :  { %2044 = vmatpush1.bf16.msra.mxu0 %v4757_v17 }
 0x448   :  { %2049 = vmatprep.subr.bf16.mxu0 %v4758_v59 }
 0x449   :  { %2003 = vmatpush2.bf16.msra.mxu1 %v3034_v20 }
 0x44a   :  { %2004 = vmatprep.subr.bf16.mxu1 %v4734_v30 }
 0x44b   :  { %2050 = vmatpush2.bf16.msra.mxu0 %v4759_v8 }
 0x44c   :  { %2051 = vmatprep.subr.bf16.mxu0 %v4760_v0 }
 0x44d   :  { %2005 = vmatpush2.bf16.msra.mxu1 %v3035_v25  ;;  %v3057_v25 = vld [vmem:[%s4658_s4 + $0x40] sm:$0xff]  }
 0x44e   :  { %2006 = vmatprep.subr.bf16.mxu1 %v4734_v30 }
 0x44f   :  { %2052 = vmatpush2.bf16.msra.mxu0 %v4761_v12 }
 0x450   :  { %2053 = vmatprep.subr.bf16.mxu0 %v4762_v13  ;;  %v4771_v13 = vld [vmem:[#allocation7_spill] sm:$0xff] }
 0x451   :  { %2007 = vmatpush2.bf16.msra.mxu1 %v3036_v34  ;;  %v3058_v34 = vld [vmem:[%s4658_s4 + $0x38] sm:$0xff]  }
 0x452   :  { %2008 = vmatprep.subr.bf16.mxu1 %v4734_v30 }
 0x453   :  { %2054 = vmatpush2.bf16.msra.mxu0 %v4763_v55 }
 0x454   :  { %2055 = vmatprep.subr.bf16.mxu0 %v4764_v46 }
 0x455   :  { %2009 = vmatpush2.bf16.msra.mxu1 %v3037_v49  ;;  %v3059_v49 = vld [vmem:[%s4658_s4 + $0x30] sm:$0xff]  }
 0x456   :  { %2070 = vmatprep.subr.bf16.mxu1 %v4770_v33  ;;  %v4773_v33 = vld [vmem:[#allocation18_spill] sm:$0xff] }
 0x457   :  { %2056 = vmatpush2.bf16.msra.mxu0 %v4765_v24 }
 0x458   :  { %2057 = vmatprep.subr.bf16.mxu0 %v4766_v23 }
 0x45b   :  { %2058 = vmatpush2.bf16.msra.mxu0 %v4767_v42 }
 0x45c   :  { %2059 = vmatprep.subr.bf16.mxu0 %v4768_v9  ;;  %v3052_v9 = vld [vmem:[%s4658_s4 + $0x8] sm:$0xff]  }
 0x45f   :  { %2060 = vmatpush2.bf16.msra.mxu0 %v4769_v54  ;;  %v3055_v54 = vld [vmem:[%s4658_s4 + $0x50] sm:$0xff]  }
 0x460   :  { %2217 = vmatprep.subr.bf16.mxu0 %v4734_v30 }
 0x462   :  { %2062 = vmatmul.mubr.bf16.vlgmr.msra.gmra.mxu0 %v2763_v22  ;;  %v3056_v22 = vld [vmem:[%s4658_s4 + $0x48] sm:$0xff]  }
 0x4b2   :  { %v1773_v51 = vpop.f32.mrf.mxu0 }
 0x4b3   :  { %v4503_v19 = vadd.f32 %v1773_v51, %v4367_v48  ;;  %v2260_v51 = vsub.s32 2, %v4773_v33 }
 0x4b4   :  { %v1775_v50 = vpop.f32.mrf.mxu0 }
 0x4b6   :  { %v1776_v18 = vpop.f32.mrf.mxu0 }
 0x4b8   :  { %v1777_v62 = vpop.f32.mrf.mxu0 }
 0x4ea   :  { %v1865_v60 = vpop.f32.mrf.mxu0 }
 0x4eb   :  { %v1866_v61 = vadd.f32 %v1865_v60, %v4398_v3 }
 0x4ec   :  { %v1867_v56 = vpop.f32.mrf.mxu0 }
 0x4ed   :  { %v1872_v58 = vadd.f32 %v1866_v61, %v3805_v57  ;;  %v1868_v17 = vadd.f32 %v1867_v56, %v4401_v7 }
 0x4ee   :  { %v1869_v59 = vpop.f32.mrf.mxu0 }
 0x4ef   :  { %v1873_v63 = vadd.f32 %v1868_v17, %v3808_v15  ;;  %v1874_v8 = vmax.f32 %v1872_v58, 0.0 }
 0x4f0   :  { %v1870_v0 = vpop.f32.mrf.mxu0 }
 0x4f1   :  { %v1875_v6 = vmax.f32 %v1873_v63, 0.0  ;;  %v1876_v48 = vpack.c.bf16 %v1874_v8, %v1874_v8  ;;  %v3060_v63 = vld [vmem:[%s4658_s4 + $0x28] sm:$0xff]   ;;  %v3061_v8 = vld [vmem:[%s4658_s4 + $0x20] sm:$0xff]   ;;  %v2275_v0 = vsub.s32 3, %v4773_v33 }
 0x4f3   :  { %v1877_v12 = vpack.c.bf16 %v1875_v6, %v1875_v6 }
 0x4f5   :  { %2762 = vmatprep.mubr.msk.bf16.mxu1 %vm1143_vm5, %v1877_v12 }
 0x4f6   :  { %2011 = vmatmul.mubr.bf16.vlgmr.msra.gmra.mxu1 %v1876_v48 }
 0x4f7   :  { %2071 = vmatpush1.bf16.msra.mxu1 %v3816_v4  ;;  %2766 = vmatprep.mubr.msk.bf16.mxu1 %vm675_vm4, %v4771_v13 }
 0x4f8   :  { %2072 = vmatprep.subr.bf16.mxu1 %v3824_v10 }
 0x4fb   :  { %2073 = vmatpush1.bf16.msra.mxu1 %v3830_v16 }
 0x4fc   :  { %2074 = vmatprep.subr.bf16.mxu1 %v3836_v5 }
 0x4ff   :  { %2075 = vmatpush1.bf16.msra.mxu1 %v3842_v14  ;;  %v4772_v14 = vld [vmem:[#allocation22_spill] sm:$0xff] }
 0x500   :  { %2076 = vmatprep.subr.bf16.mxu1 %v3848_v26  ;;  %v3038_v26 = vld [vmem:[%s4657_s3 + $0x218] sm:$0xff]  }
 0x501   :  { %2218 = vmatpush1.bf16.msra.mxu0 %v3038_v26 }
 0x502   :  { %2219 = vmatprep.subr.bf16.mxu0 %v4734_v30 }
 0x503   :  { %2077 = vmatpush1.bf16.msra.mxu1 %v3854_v40  ;;  %v3039_v40 = vld [vmem:[%s4657_s3 + $0x210] sm:$0xff]  }
 0x504   :  { %2078 = vmatprep.subr.bf16.mxu1 %v3860_v11  ;;  %v3040_v11 = vld [vmem:[%s4657_s3 + $0x208] sm:$0xff]  }
 0x505   :  { %2220 = vmatpush1.bf16.msra.mxu0 %v3039_v40  ;;  %v2454_v40 = vld [vmem:[%s4660_s6] sm:$0xff] }
 0x506   :  { %2221 = vmatprep.subr.bf16.mxu0 %v4734_v30  ;;  %vm2455_vm7 = vcmp.eq.f32.partialorder %v2454_v40, 0.0 }
 0x507   :  { %2079 = vmatpush1.bf16.msra.mxu1 %v4099_v28  ;;  %v3041_v28 = vld [vmem:[%s4657_s3 + $0x200] sm:$0xff]  }
 0x508   :  { %2080 = vmatprep.subr.bf16.mxu1 %v4105_v21  ;;  %v3042_v21 = vld [vmem:[%s4657_s3 + $0x1f8] sm:$0xff]  }
 0x509   :  { %2222 = vmatpush1.bf16.msra.mxu0 %v3040_v11 }
 0x50a   :  { %2223 = vmatprep.subr.bf16.mxu0 %v4734_v30 }
 0x50b   :  { %2081 = vmatpush1.bf16.msra.mxu1 %v4111_v32  ;;  %v3043_v32 = vld [vmem:[%s4657_s3 + $0x1f0] sm:$0xff]  }
 0x50c   :  { %2082 = vmatprep.subr.bf16.mxu1 %v4117_v36  ;;  %v3044_v36 = vld [vmem:[%s4657_s3 + $0x1e8] sm:$0xff]  }
 0x50d   :  { %2224 = vmatpush1.bf16.msra.mxu0 %v3041_v28 }
 0x50e   :  { %2225 = vmatprep.subr.bf16.mxu0 %v4734_v30 }
 0x50f   :  { %2083 = vmatpush1.bf16.msra.mxu1 %v4123_v38  ;;  %v3045_v38 = vld [vmem:[%s4657_s3 + $0x1e0] sm:$0xff]  }
 0x510   :  { %2084 = vmatprep.subr.bf16.mxu1 %v4129_v2  ;;  %v3046_v2 = vld [vmem:[%s4657_s3 + $0x238] sm:$0xff]  }
 0x511   :  { %2226 = vmatpush1.bf16.msra.mxu0 %v3042_v21 }
 0x512   :  { %2227 = vmatprep.subr.bf16.mxu0 %v4734_v30 }
 0x513   :  { %2085 = vmatpush1.bf16.msra.mxu1 %v4135_v1  ;;  %v3047_v1 = vld [vmem:[%s4657_s3 + $0x230] sm:$0xff]  }
 0x514   :  { %2090 = vmatprep.subr.bf16.mxu1 %v4141_v27  ;;  %v3048_v27 = vld [vmem:[%s4657_s3 + $0x228] sm:$0xff]  }
 0x515   :  { %2228 = vmatpush1.bf16.msra.mxu0 %v3043_v32 }
 0x516   :  { %2229 = vmatprep.subr.bf16.mxu0 %v4734_v30 }
 0x517   :  { %2091 = vmatpush2.bf16.msra.mxu1 %v4147_v29  ;;  %v3049_v29 = vld [vmem:[%s4657_s3 + $0x220] sm:$0xff]  }
 0x518   :  { %2092 = vmatprep.subr.bf16.mxu1 %v4153_v31  ;;  %v3050_v31 = vld [vmem:[%s4658_s4 + $0x18] sm:$0xff]  }
 0x519   :  { %2230 = vmatpush1.bf16.msra.mxu0 %v3044_v36 }
 0x51a   :  { %2231 = vmatprep.subr.bf16.mxu0 %v4734_v30 }
 0x51b   :  { %2093 = vmatpush2.bf16.msra.mxu1 %v4159_v35  ;;  %v3142_v35 = vmov 0.0  }
 0x51c   :  { %2094 = vmatprep.subr.bf16.mxu1 %v4165_v37  ;;  %v3051_v37 = vld [vmem:[%s4658_s4 + $0x10] sm:$0xff]  }
 0x51d   :  { %2232 = vmatpush1.bf16.msra.mxu0 %v3045_v38 }
 0x51e   :  { %2241 = vmatprep.subr.bf16.mxu0 %v4734_v30 }
 0x51f   :  { %2095 = vmatpush2.bf16.msra.mxu1 %v4171_v39 }
 0x520   :  { %2096 = vmatprep.subr.bf16.mxu1 %v4177_v41 }
 0x521   :  { %2242 = vmatpush2.bf16.msra.mxu0 %v3046_v2 }
 0x522   :  { %v2063_v4 = vpop.f32.mrf.mxu0  ;;  %2243 = vmatprep.subr.bf16.mxu0 %v4734_v30 }
 0x523   :  { %2097 = vmatpush2.bf16.msra.mxu1 %v4183_v43 }
 0x524   :  { %v2065_v10 = vpop.f32.mrf.mxu0  ;;  %2098 = vmatprep.subr.bf16.mxu1 %v4189_v45 }
 0x525   :  { %2244 = vmatpush2.bf16.msra.mxu0 %v3047_v1 }
 0x526   :  { %v2067_v16 = vpop.f32.mrf.mxu0  ;;  %2245 = vmatprep.subr.bf16.mxu0 %v4734_v30 }
 0x527   :  { %2099 = vmatpush2.bf16.msra.mxu1 %v4195_v47 }
 0x528   :  { %v2068_v5 = vpop.f32.mrf.mxu0  ;;  %2100 = vmatprep.subr.bf16.mxu1 %v4408_v53 }
 0x529   :  { %2246 = vmatpush2.bf16.msra.mxu0 %v3048_v27 }
 0x52a   :  { %2247 = vmatprep.subr.bf16.mxu0 %v4734_v30 }
 0x52b   :  { %2101 = vmatpush2.bf16.msra.mxu1 %v4416_v52 }
 0x52c   :  { %2838 = vmatprep.subr.bf16.mxu1 %v3142_v35 }
 0x52d   :  { %2248 = vmatpush2.bf16.msra.mxu0 %v3049_v29 }
 0x52e   :  { %2103 = vmatmul.mubr.bf16.vlgmr.msra.gmra.mxu1 %v4772_v14  ;;  %2850 = vmatprep.subr.bf16.mxu0 %v3142_v35  ;;  %v2364_v14 = vsub.s32 4, %v4773_v33 }
 0x52f   :  { %2839 = vmatpush3.bf16.msra.mxu1 %v3050_v31  ;;  %2846 = vmatprep.mubr.msk.bf16.mxu1 %vm3143_vm6, %v3142_v35 }
 0x530   :  { %2840 = vmatprep.subr.bf16.mxu1 %v3142_v35 }
 0x533   :  { %2841 = vmatpush3.bf16.msra.mxu1 %v3051_v37 }
 0x534   :  { %2842 = vmatprep.subr.bf16.mxu1 %v3142_v35 }
 0x537   :  { %2843 = vmatpush3.bf16.msra.mxu1 %v3052_v9 }
 0x538   :  { %2844 = vmatprep.subr.bf16.mxu1 %v3142_v35 }
 0x5b6   :  { %v2012_v30 = vpop.f32.mrf.mxu1 }
 0x5b7   :  { %v2018_v39 = vadd.f32 %v2012_v30, %v4503_v19  ;;  %v3118_v19 = vld [vmem:[%s4659_s5] sm:$0xff] }
 0x5b8   :  { %v2014_v41 = vpop.f32.mrf.mxu1  ;;  %v2261_v50 = vrot.slane %v3118_v19, %v2260_v51  ;;  %v2276_v6 = vrot.slane %v3118_v19, %v2275_v0  ;;  %v2365_v26 = vrot.slane %v3118_v19, %v2364_v14 }
 0x5ba   :  { %v2015_v43 = vpop.f32.mrf.mxu1 }
 0x5bc   :  { %v2016_v45 = vpop.f32.mrf.mxu1 }
 0x5ee   :  { %v2104_v47 = vpop.f32.mrf.mxu1 }
 0x5ef   :  { %v2105_v3 = vadd.f32 %v2104_v47, %v2063_v4 }
 0x5f0   :  { %v2106_v7 = vpop.f32.mrf.mxu1 }
 0x5f1   :  { %v2111_v53 = vadd.f32 %v2105_v3, %v3805_v57  ;;  %v2107_v52 = vadd.f32 %v2106_v7, %v2065_v10  ;;  %v3053_v57 = vld [vmem:[%s4658_s4] sm:$0xff]  }
 0x5f2   :  { %v2108_v44 = vpop.f32.mrf.mxu1  ;;  %2845 = vmatpush3.bf16.msra.mxu1 %v3053_v57 }
 0x5f3   :  { %v2112_v55 = vadd.f32 %v2107_v52, %v3808_v15  ;;  %v2113_v46 = vmax.f32 %v2111_v53, 0.0  ;;  %v3054_v15 = vld [vmem:[%s4658_s4 + $0x58] sm:$0xff]   ;;  %s3144_s4 = smov [#allocation3]  }
 0x5f4   :  { %v2109_v20 = vpop.f32.mrf.mxu1  ;;  %s2464_s17 = sshll.u32 %s3144_s4, 4  ;;  %s2465_s17 = int_to_ptr.vmem [resolvable:$true] %s2464_s17 }
 0x5f5   :  { %v2114_v24 = vmax.f32 %v2112_v55, 0.0  ;;  %v2115_v42 = vpack.c.bf16 %v2113_v46, %v2113_v46  ;;  %s3119_s18 = scalar_lea.vmem %s2465_s17, 128  ;;  %p3124_p1 = scmp.lt.s32.totalorder %s2465_s17, %s2465_s17 }
 0x5f6   :  { %p3120_p0 = scmp.ne.s32.totalorder %s2465_s17, %s3119_s18  ;;  %p3125_p2 = scmp.lt.s32.totalorder %s3119_s18, %s3119_s18 }
 0x5f7   :  { %v2116_v23 = vpack.c.bf16 %v2114_v24, %v2114_v24 }
 0x5f8   :  { %p3126_p3 = por %p3125_p2, %p3124_p1 }
 0x5f9   :  { %2803 = vmatprep.mubr.msk.bf16.mxu0 %vm1143_vm5, %v2116_v23 }
 0x5fa   :  { %2250 = vmatmul.mubr.bf16.vlgmr.msra.gmra.mxu0 %v2115_v42  ;;  %p3127_p4 = pnand %p3126_p3, %p3120_p0 }
 0x5fb   :  { %2866 = vmatprep.mubr.msk.bf16.mxu0 %vm3143_vm6, %v3142_v35  ;;  %2851 = vmatpush3.bf16.msra.mxu0 %v3054_v15 }
 0x5fc   :  { %2852 = vmatprep.subr.bf16.mxu0 %v3142_v35 }
 0x5ff   :  { %2853 = vmatpush3.bf16.msra.mxu0 %v3055_v54 }
 0x600   :  { %2854 = vmatprep.subr.bf16.mxu0 %v3142_v35 }
 0x603   :  { %2855 = vmatpush3.bf16.msra.mxu0 %v3056_v22 }
 0x604   :  { %2856 = vmatprep.subr.bf16.mxu0 %v3142_v35 }
 0x607   :  { %2857 = vmatpush3.bf16.msra.mxu0 %v3057_v25 }
 0x608   :  { %2858 = vmatprep.subr.bf16.mxu0 %v3142_v35 }
 0x60b   :  { %2859 = vmatpush3.bf16.msra.mxu0 %v3058_v34 }
 0x60c   :  { %2860 = vmatprep.subr.bf16.mxu0 %v3142_v35 }
 0x60f   :  { %2861 = vmatpush3.bf16.msra.mxu0 %v3059_v49 }
 0x610   :  { %2862 = vmatprep.subr.bf16.mxu0 %v3142_v35 }
 0x613   :  { %2863 = vmatpush3.bf16.msra.mxu0 %v3060_v63 }
 0x614   :  { %2864 = vmatprep.subr.bf16.mxu0 %v3142_v35 }
 0x617   :  { %2865 = vmatpush3.bf16.msra.mxu0 %v3061_v8 }
 0x6ba   :  { %v2251_v18 = vpop.f32.mrf.mxu0 }
 0x6bb   :  { %v2257_v62 = vadd.f32 %v2251_v18, %v2018_v39 }
 0x6bc   :  { %v2253_v60 = vpop.f32.mrf.mxu0 }
 0x6bd   :  { %v2262_v61 = vadd.f32 %v2261_v50, %v2257_v62 }
 0x6be   :  { %v2254_v56 = vpop.f32.mrf.mxu0 }
 0x6bf   :  { %v2263_v58 = vmax.f32 %v2262_v61, 0.0 }
 0x6c0   :  { %v2255_v17 = vpop.f32.mrf.mxu0 }
 0x6c1   :  { %v2264_v59 = vpack.c.bf16 %v2263_v58, %v2263_v58 }
 0x6c3   :  { %2847 = vmatmul.mubr.msk.bf16.vlgmr.msra.gmra.mxu1 %vm1143_vm5, %v2264_v59 }
 0x783   :  { %v2338_v12 = vpop.f32.mrf.mxu1 }
 0x784   :  { %v2339_v48 = vadd.f32 %v2338_v12, %v2276_v6 }
 0x785   :  { %v2848_v13 = vpop.f32.mrf.mxu1 }
 0x786   :  { %v2344_v4 = vmax.f32 %v2339_v48, 0.0 }
 0x787   :  { %v2341_v10 = vpop.f32.mrf.mxu1 }
 0x788   :  { %v2361_v16 = vpack.c.bf16 %v2344_v4, %v2344_v4 }
 0x789   :  { %v2849_v5 = vpop.f32.mrf.mxu1 }
 0x78a   :  { %2867 = vmatmul.mubr.bf16.vlgmr.msra.gmra.mxu0 %v2361_v16 }
 0x84a   :  { %v2448_v11 = vpop.f32.mrf.mxu0 }
 0x84b   :  { %v2449_v28 = vadd.f32 %v2448_v11, %v2365_v26 }
 0x84c   :  { %v2868_v21 = vpop.f32.mrf.mxu0 }
 0x84d   :  { %v2456_v32 = vsel %vm2455_vm7, -inf, %v2449_v28 }
 0x84e   :  { %v2451_v36 = vpop.f32.mrf.mxu0  ;;  %2457 = vst [vmem:[#allocation3] sm:$0xff] %v2456_v32 }
 0x84f   :  { %3130 = shalt.err (!%p3127_p4)
}
 0x850   :  { %2467 = dma.vmem_to_hbm [thread:$0]  %s2465_s17, 128, %s4661_s7, [#allocation4]   ;;  %v2869_v38 = vpop.f32.mrf.mxu0 }
 0x851   :  { %3139 = dma.done.wait [#allocation4], 128  }
 0x852   :  { %3140 = vsyncadd [#allocation4], 4294967168 }
 0x853   :  { %2471 = vsyncpa [#allocation4], 1 }

</bundles_post_ra>
